<compile_context>
chip_gen: v5e
topology: v5e:2x2
jax: 0.10.0
libtpu: 0.0.40
codegen_flags: <defaults>
</compile_context>

<pallas_src>
import functools

import jax
import jax.numpy as jnp
from jax import lax
from jax.experimental import pallas as pl
from jax.experimental.pallas import tpu as pltpu

BN_EPS = 1e-5


# --------------------------------------------------------------------------
# Fused (folded Conv1+BN) -> ReLU -> Conv2, one (batch, N-tile) per grid step
# --------------------------------------------------------------------------
def _pos_embed_kernel(x_ref, w1_ref, b1_ref, w2_ref, b2_ref, o_ref):
    # x_ref : (1, Cin_pad, tile_n)   w1_ref: (F, Cin_pad)   b1_ref: (F, 1)
    # w2_ref: (F, F)                 b2_ref: (F, 1)         o_ref : (1, F, tile_n)
    x = x_ref[0]                                            # (Cin_pad, tile_n)
    # Conv1d #1 with BatchNorm folded into (w1, b1).  On the bf16 path both
    # operands are bf16 -> native bf16 MXU with f32 accumulation.
    h = jnp.dot(w1_ref[...], x, preferred_element_type=jnp.float32) + b1_ref[...]
    h = jnp.maximum(h, 0.0)                                 # ReLU
    # Conv1d #2: produced directly in (F, tile_n) layout -> lane-dense store.
    y = jnp.dot(w2_ref[...], h.astype(w2_ref.dtype),
                preferred_element_type=jnp.float32) + b2_ref[...]
    o_ref[0] = y.astype(o_ref.dtype)


def _choose_tile_n(n, min_tiles):
    """Pick a lane-dense position tile and the (possibly padded) N it implies."""
    for t in (1024, 512, 256, 128):
        if n % t == 0 and n // t >= min_tiles:
            return t, n
    if n < 128 and min_tiles <= 1:
        return n, n                        # tiny N: one full-extent (masked) tile
    # Padding needed: biggest tile whose padding waste stays <= 25% and which
    # still yields >= min_tiles grid steps.
    for t in (512, 256, 128):
        n_pad = pl.cdiv(n, t) * t
        if n_pad // t >= min_tiles and 4 * (n_pad - n) <= n_pad:
            return t, n_pad
    n_pad = pl.cdiv(n, 128) * 128
    return 128, n_pad


@functools.partial(jax.jit, static_argnames=("use_bf16", "out_dtype"))
def position_embedding_learned(xyz, params, use_bf16=True, out_dtype=jnp.float32):
    """xyz: (B, N, Cin) -> (B, F, N), matching the torch module's forward.

    use_bf16 : run both MXU matmuls in bf16 (f32 accumulation).  Recommended on
               all TPU generations (v5e/v6e/v7x MXUs are bf16-native).
    out_dtype: output dtype.  jnp.bfloat16 halves the dominant HBM writeback
               traffic but is a semantic change vs. the f32 torch module.
    """
    w1, b1, gamma, beta, w2, b2 = params
    B, N, c_in = xyz.shape
    n_feats = w1.shape[0]
    M = B * N                                               # real token count

    cin_pad = pl.cdiv(c_in, 8) * 8
    min_tiles = 2 if (B == 1 and N >= 256) else 1           # v7x megacore: >=2 steps
    tile_n, n_pad = _choose_tile_n(N, min_tiles)
    n_tiles = n_pad // tile_n

    # ---- BatchNorm batch statistics, analytically from the input moments ----
    # h = W1 x + b1 is affine in x, so (training-mode, biased variance):
    #   mean_h = W1 mu_x + b1,   var_h = diag(W1 Cov_x W1^T).
    # x is tiny (M x Cin); a *centered* covariance avoids E[x^2]-E[x]^2
    # cancellation, and plain XLA fuses this with the transpose/pad below.
    # TODO(synk): eval-mode parity (running_mean/var) not modeled; the torch
    # module's default forward uses batch stats, which is what we match.
    x_flat = xyz.reshape(M, c_in).astype(jnp.float32)
    mu_x = jnp.mean(x_flat, axis=0)                         # (Cin,)
    xc = x_flat - mu_x
    cov_x = (xc.T @ xc) / M                                 # (Cin, Cin)
    mean_h = w1 @ mu_x + b1
    var_h = jnp.maximum(jnp.einsum("fi,ij,fj->f", w1, cov_x, w1), 0.0)
    scale = gamma * lax.rsqrt(var_h + BN_EPS)

    # Fold Conv1 + BatchNorm into a single affine map (tiny F x Cin arithmetic).
    w1f = jnp.pad(w1 * scale[:, None], ((0, 0), (0, cin_pad - c_in)))   # (F, Cin_pad)
    b1f = ((b1 - mean_h) * scale + beta)[:, None]                       # (F, 1)

    # (B, N, Cin) -> (B, Cin_pad, N_pad): same transpose the torch module does;
    # x is ~1% of the output HBM bytes, so this is cheap.
    x_t = jnp.pad(jnp.transpose(x_flat.reshape(B, N, c_in), (0, 2, 1)),
                  ((0, 0), (0, cin_pad - c_in), (0, n_pad - N)))

    in_dt = jnp.bfloat16 if use_bf16 else jnp.float32
    x_k = x_t.astype(in_dt)
    w1k = w1f.astype(in_dt)
    w2k = w2.astype(in_dt)

    grid = (B, n_tiles)
    const = lambda b, j: (0, 0)   # constant block index -> stays VMEM-resident
    out = pl.pallas_call(
        _pos_embed_kernel,
        out_shape=jax.ShapeDtypeStruct((B, n_feats, n_pad), out_dtype),
        grid=grid,
        in_specs=[
            pl.BlockSpec((1, cin_pad, tile_n), lambda b, j: (b, 0, j)),
            pl.BlockSpec((n_feats, cin_pad), const),
            pl.BlockSpec((n_feats, 1), const),
            pl.BlockSpec((n_feats, n_feats), const),
            pl.BlockSpec((n_feats, 1), const),
        ],
        out_specs=pl.BlockSpec((1, n_feats, tile_n), lambda b, j: (b, 0, j)),
        compiler_params=pltpu.CompilerParams(
            dimension_semantics=("parallel", "parallel"),
            vmem_limit_bytes=32 * 1024 * 1024),
    )(x_k, w1k, b1f, w2k, b2[:, None])

    return out[:, :, :N] if n_pad != N else out


# --------------------------------------------------------------------------
# Pure-JAX reference and synthetic parameters (for the in-script check)
# --------------------------------------------------------------------------
def _reference(xyz, params):
    w1, b1, gamma, beta, w2, b2 = params
    B, N, _ = xyz.shape
    F_ = w1.shape[0]
    x = xyz.reshape(B * N, -1).astype(jnp.float32)
    h = x @ w1.T + b1
    mean = jnp.mean(h, axis=0, keepdims=True)
    var = jnp.mean((h - mean) ** 2, axis=0, keepdims=True)
    h = (h - mean) / jnp.sqrt(var + BN_EPS) * gamma + beta
    h = jnp.maximum(h, 0.0)
    o = h @ w2.T + b2
    return o.reshape(B, N, F_).transpose(0, 2, 1)


def _init_params(key, input_channel, num_pos_feats):
    """Deterministic synthetic parameters (shapes match the torch module)."""
    k1, k2, k3, k4, k5 = jax.random.split(key, 5)
    bound1 = 1.0 / jnp.sqrt(input_channel)
    w1 = jax.random.uniform(k1, (num_pos_feats, input_channel), jnp.float32,
                            -bound1, bound1)
    b1 = jax.random.uniform(k2, (num_pos_feats,), jnp.float32, -bound1, bound1)
    gamma = 1.0 + 0.1 * jax.random.normal(k3, (num_pos_feats,), jnp.float32)
    beta = 0.1 * jax.random.normal(k4, (num_pos_feats,), jnp.float32)
    bound2 = 1.0 / jnp.sqrt(num_pos_feats)
    w2 = jax.random.uniform(k5, (num_pos_feats, num_pos_feats), jnp.float32,
                            -bound2, bound2)
    b2 = jnp.zeros((num_pos_feats,), jnp.float32)
    return (w1, b1, gamma, beta, w2, b2)


if __name__ == "__main__":
    key = jax.random.PRNGKey(0)
    k_x, k_p = jax.random.split(key)

    # Config 1: lane-dense tiling path, module-default F=288.
    B, N, C_IN, F_ = 2, 256, 3, 288
    xyz = jax.random.normal(k_x, (B, N, C_IN), jnp.float32)
    params = _init_params(k_p, C_IN, F_)
    ref = _reference(xyz, params)

    out_f32 = jax.block_until_ready(
        position_embedding_learned(xyz, params, use_bf16=False))
    assert out_f32.shape == (B, F_, N), out_f32.shape
    if not jnp.allclose(out_f32, ref, atol=1e-3, rtol=1e-3):
        raise AssertionError("f32 Pallas kernel output mismatch vs reference")

    out_bf16 = jax.block_until_ready(
        position_embedding_learned(xyz, params, use_bf16=True))
    if not jnp.allclose(out_bf16, ref, atol=6e-2, rtol=6e-2):
        raise AssertionError("bf16 Pallas kernel output mismatch vs reference")

    out_bf16o = jax.block_until_ready(
        position_embedding_learned(xyz, params, use_bf16=True,
                                   out_dtype=jnp.bfloat16))
    assert out_bf16o.dtype == jnp.bfloat16
    if not jnp.allclose(out_bf16o.astype(jnp.float32), ref, atol=8e-2, rtol=8e-2):
        raise AssertionError("bf16-output Pallas kernel mismatch vs reference")

    # Config 2: B == 1 -> tile capped so the grid has >= 2 parallel steps
    # (v7x megacore); also exercises tile selection at N=512.
    B1, N1, F1 = 1, 512, 96
    xyz1 = jax.random.normal(jax.random.PRNGKey(3), (B1, N1, C_IN), jnp.float32)
    params1 = _init_params(jax.random.PRNGKey(4), C_IN, F1)
    out1 = jax.block_until_ready(
        position_embedding_learned(xyz1, params1, use_bf16=False))
    assert out1.shape == (B1, F1, N1), out1.shape
    if not jnp.allclose(out1, _reference(xyz1, params1), atol=1e-3, rtol=1e-3):
        raise AssertionError("B=1 megacore-path output mismatch vs reference")

    # Config 3: tiny N (< 128) exercises the single full-extent-tile path.
    B2, N2, F2 = 2, 16, 64
    xyz2 = jax.random.normal(jax.random.PRNGKey(1), (B2, N2, C_IN), jnp.float32)
    params2 = _init_params(jax.random.PRNGKey(2), C_IN, F2)
    out2 = jax.block_until_ready(
        position_embedding_learned(xyz2, params2, use_bf16=False))
    assert out2.shape == (B2, F2, N2), out2.shape
    if not jnp.allclose(out2, _reference(xyz2, params2), atol=1e-3, rtol=1e-3):
        raise AssertionError("small-N Pallas kernel output mismatch vs reference")

    print("KERNEL_OK")
</pallas_src>

<mosaic_0001>
module attributes {stable_mosaic.version = 11 : i64} {
  func.func @_pos_embed_kernel(%arg0: i32, %arg1: i32, %arg2: memref<1x8x256xf32, #tpu.memory_space<vmem>>, %arg3: memref<288x8xf32, #tpu.memory_space<vmem>>, %arg4: memref<288x1xf32, #tpu.memory_space<vmem>>, %arg5: memref<288x288xf32, #tpu.memory_space<vmem>>, %arg6: memref<288x1xf32, #tpu.memory_space<vmem>>, %arg7: memref<1x288x256xf32, #tpu.memory_space<vmem>>) attributes {dimension_semantics = [#tpu.dimension_semantics<parallel>, #tpu.dimension_semantics<parallel>], iteration_bounds = array<i64: 2, 1>, scalar_prefetch = 0 : i64, scratch_operands = 0 : i64, tpu.core_type = #tpu.core_type<tc>, window_params = [{transform_indices = @transform_0, window_bounds = array<i64: 1, 8, 256>}, {pipeline_mode = #tpu.pipeline_mode<synchronous>, transform_indices = @transform_1, window_bounds = array<i64: 288, 8>}, {pipeline_mode = #tpu.pipeline_mode<synchronous>, transform_indices = @transform_2, window_bounds = array<i64: 288, 1>}, {pipeline_mode = #tpu.pipeline_mode<synchronous>, transform_indices = @transform_3, window_bounds = array<i64: 288, 288>}, {pipeline_mode = #tpu.pipeline_mode<synchronous>, transform_indices = @transform_4, window_bounds = array<i64: 288, 1>}, {transform_indices = @transform_5, window_bounds = array<i64: 1, 288, 256>}]} {
    %c0 = arith.constant 0 : index
    %c0_0 = arith.constant 0 : index
    %c0_1 = arith.constant 0 : index
    %0 = vector.load %arg2[%c0, %c0_0, %c0_1] : memref<1x8x256xf32, #tpu.memory_space<vmem>>, vector<1x8x256xf32>
    %1 = vector.shape_cast %0 : vector<1x8x256xf32> to vector<8x256xf32>
    %c0_2 = arith.constant 0 : index
    %c0_3 = arith.constant 0 : index
    %2 = vector.load %arg3[%c0_2, %c0_3] : memref<288x8xf32, #tpu.memory_space<vmem>>, vector<288x8xf32>
    %cst = arith.constant dense<0.000000e+00> : vector<288x256xf32>
    %3 = tpu.matmul %2, %1, %cst {dimension_numbers = #tpu.dot_dimension_numbers<[1], [0], [0], [1], [0, 0, 1, 1], [], []>} : vector<288x8xf32>, vector<8x256xf32>, vector<288x256xf32> -> vector<288x256xf32>
    %c0_4 = arith.constant 0 : index
    %c0_5 = arith.constant 0 : index
    %4 = vector.load %arg4[%c0_4, %c0_5] : memref<288x1xf32, #tpu.memory_space<vmem>>, vector<288x1xf32>
    %5 = vector.broadcast %4 : vector<288x1xf32> to vector<288x256xf32>
    %6 = arith.addf %3, %5 : vector<288x256xf32>
    %cst_6 = arith.constant 0.000000e+00 : f32
    %7 = vector.broadcast %cst_6 : f32 to vector<288x256xf32>
    %8 = arith.maximumf %6, %7 : vector<288x256xf32>
    %c0_7 = arith.constant 0 : index
    %c0_8 = arith.constant 0 : index
    %9 = vector.load %arg5[%c0_7, %c0_8] : memref<288x288xf32, #tpu.memory_space<vmem>>, vector<288x288xf32>
    %cst_9 = arith.constant dense<0.000000e+00> : vector<288x256xf32>
    %10 = tpu.matmul %9, %8, %cst_9 {dimension_numbers = #tpu.dot_dimension_numbers<[1], [0], [0], [1], [0, 0, 1, 1], [], []>} : vector<288x288xf32>, vector<288x256xf32>, vector<288x256xf32> -> vector<288x256xf32>
    %c0_10 = arith.constant 0 : index
    %c0_11 = arith.constant 0 : index
    %11 = vector.load %arg6[%c0_10, %c0_11] : memref<288x1xf32, #tpu.memory_space<vmem>>, vector<288x1xf32>
    %12 = vector.broadcast %11 : vector<288x1xf32> to vector<288x256xf32>
    %13 = arith.addf %10, %12 : vector<288x256xf32>
    %c0_12 = arith.constant 0 : index
    %c0_13 = arith.constant 0 : index
    %c0_14 = arith.constant 0 : index
    %14 = vector.load %arg7[%c0_12, %c0_13, %c0_14] : memref<1x288x256xf32, #tpu.memory_space<vmem>>, vector<1x288x256xf32>
    %15 = vector.shape_cast %14 : vector<1x288x256xf32> to vector<288x256xf32>
    %16 = vector.shape_cast %13 : vector<288x256xf32> to vector<1x288x256xf32>
    tpu.vector_store %arg7[%c0_12, %c0_13, %c0_14], %16 {strides = array<i32>} : memref<1x288x256xf32, #tpu.memory_space<vmem>>, vector<1x288x256xf32>,
    return
  }
  func.func @transform_0(%arg0: i32, %arg1: i32) -> (i32, i32, i32) {
    %c0_i32 = arith.constant 0 : i32
    %c0_i32_0 = arith.constant 0 : i32
    return %arg0, %c0_i32, %arg1 : i32, i32, i32
  }
  func.func @transform_1(%arg0: i32, %arg1: i32) -> (i32, i32) {
    %c0_i32 = arith.constant 0 : i32
    %c0_i32_0 = arith.constant 0 : i32
    %c0_i32_1 = arith.constant 0 : i32
    return %c0_i32, %c0_i32_0 : i32, i32
  }
  func.func @transform_2(%arg0: i32, %arg1: i32) -> (i32, i32) {
    %c0_i32 = arith.constant 0 : i32
    %c0_i32_0 = arith.constant 0 : i32
    %c0_i32_1 = arith.constant 0 : i32
    return %c0_i32, %c0_i32_0 : i32, i32
  }
  func.func @transform_3(%arg0: i32, %arg1: i32) -> (i32, i32) {
    %c0_i32 = arith.constant 0 : i32
    %c0_i32_0 = arith.constant 0 : i32
    %c0_i32_1 = arith.constant 0 : i32
    return %c0_i32, %c0_i32_0 : i32, i32
  }
  func.func @transform_4(%arg0: i32, %arg1: i32) -> (i32, i32) {
    %c0_i32 = arith.constant 0 : i32
    %c0_i32_0 = arith.constant 0 : i32
    %c0_i32_1 = arith.constant 0 : i32
    return %c0_i32, %c0_i32_0 : i32, i32
  }
  func.func @transform_5(%arg0: i32, %arg1: i32) -> (i32, i32, i32) {
    %c0_i32 = arith.constant 0 : i32
    %c0_i32_0 = arith.constant 0 : i32
    return %arg0, %c0_i32, %arg1 : i32, i32, i32
  }
}

</mosaic_0001>

<bundles_post_ra>
// kernel: position_embedding_learned.1
= control target key start
LH: loop header
LB: loop body
LE: loop exit
PB: predicated region body
PF: predicated region fallthrough
CT: control target
= control target key end

     0   :  { %10 = vsyncpa [#allocation3], 0  ;;  %s4520_s0 = inlined_call_operand.vmem [shape: f32[2,8,256], index: 0, kind: input, shape index: {}]   ;;  %s4521_s1 = inlined_call_operand.vmem [shape: f32[288,8], index: 1, kind: input, shape index: {}]   ;;  %s4522_s2 = inlined_call_operand.vmem [shape: f32[288,1], index: 2, kind: input, shape index: {}]   ;;  %s4523_s3 = inlined_call_operand.vmem [shape: f32[288,288], index: 3, kind: input, shape index: {}]   ;;  %s4524_s4 = inlined_call_operand.vmem [shape: f32[288,1], index: 4, kind: input, shape index: {}]   ;;  %s4525_s5 = inlined_call_operand.hbm [shape: f32[2,288,256], index: 5, kind: output, shape index: {}]  }
   0x1   :  { %12 = vsyncpa [#allocation3 + $0x1], 0  ;;  %s2642_s18 = smov 0   ;;  %s2644_s19 = smov 0  }
   0x2   :  { %s2646_s20 = smov 0   ;;  %s2648_s21 = smov 0  }
   0x3   :  { %s2650_s22 = smov 0   ;;  %s2652_s23 = smov 0  }
   0x4 LB: > { %s2291_s24 = sadd.s32 4294967295, %s2607_s23   ;;  %s2292_s25 = sadd.s32 4294967294, %s2607_s23   ;;  %s2607_s23 = sphi %s2652_s23, %s18_s23   ;;  %s2603_s22 = sphi %s2650_s22, %s4758_s22   ;;  %s2599_s21 = sphi %s2648_s21, %s4757_s21   ;;  %s2595_s20 = sphi %s2646_s20, %s4756_s20   ;;  %s2591_s19 = sphi %s2644_s19, %s4755_s19   ;;  %s2587_s18 = sphi %s2642_s18, %s4754_s18  }
   0x5   : > { %s30_s26 = sadd.s32 1, %s2603_s22  ;;  %s151_s27 = sadd.s32 1, %s2595_s20 }
   0x6   : > { %p32_p0 = scmp.ge.s32.totalorder %s30_s26, 2  ;;  %p161_p1 = scmp.ne.s32.totalorder %s2595_s20, %s2591_s19 }
   0x7   : > { %p162_p2 = scmp.eq.s32.totalorder %s2291_s24, 1  ;;  %p167_p3 = scmp.ne.s32.totalorder %s2591_s19, %s2587_s18 }
   0x8   : > { %s4760_s26 = smov (%p32_p0, %s30_s26), 0  ;;  %p168_p5 = scmp.eq.s32.totalorder %s2292_s25, 1 }
   0x9   : > { %p2682_p4 = por %p162_p2, %p161_p1  ;;  %s146_s29 = ssub.s32 %s2603_s22, %s4760_s26 }
   0xa   : > { %p2295_p6 = scmp.ge.s32.totalorder %s2607_s23, 1  ;;  %p149_p7 = scmp.eq.s32.totalorder %s146_s29, 0 }
   0xb   : > { %p2689_p8 = por %p168_p5, %p167_p3  ;;  %p211_p9 = scmp.lt.s32.totalorder %s2607_s23, 3 }
   0xc   : > { %s2695_s6 = scalar_select %p149_p7, %s2595_s20, %s151_s27  }
   0xd   : > { %p212_p10 = pnand %p2295_p6, %p211_p9 }
   0xf   : > { %215 = sbr.rel (%p212_p10) target bundleno = 1136 (0x470), region = 40 }
  0x14   : > { %v323_v0 = vld [vmem:[%s4522_s2 + $0xf8] sm:$0xff]  ;;  %v322_v1 = vld [vmem:[%s4522_s2 + $0xf0] sm:$0xff]  ;;  %p244_p11 = scmp.lt.s32.totalorder %s2599_s21, 1  ;;  %v2609_v3 = vmov 0   ;;  %v256_v4 = vld [vmem:[%s4521_s1] sm:$0xff]  ;;  %vm508_vm0 = vcmask 64512  }
  0x15   : > { %v307_v2 = vld [vmem:[%s4522_s2 + $0x78] sm:$0xff]  ;;  %2528 = vset.pattern.permute.xlu2 %v2609_v3  ;;  %2527 = vset.pattern.permute.xlu1 %v2609_v3  ;;  %v305_v7 = vld [vmem:[%s4522_s2 + $0x68] sm:$0xff]  ;;  %v306_v8 = vld [vmem:[%s4522_s2 + $0x70] sm:$0xff]  ;;  %vm1263_vm1 = vcmask 261120   ;;  %s2467_s8 = smul.u32 576, %s2599_s21  ;;  %s2549_s27 = scalar_lea.hbm %s4525_s5, 1152 }
  0x16   : > { %2526 = vset.pattern.permute.xlu0 %v2609_v3  ;;  %485 = vperm.xlu1 %2527, %v323_v0   ;;  %s245_s13 = scalar_select %p244_p11, %s2599_s21, 1  ;;  %v304_v9 = vld [vmem:[%s4522_s2 + $0x60] sm:$0xff]  ;;  %v257_v10 = vld [vmem:[%s4521_s1 + $0x8] sm:$0xff]  ;;  %v303_v11 = vld [vmem:[%s4522_s2 + $0x58] sm:$0xff] }
  0x17   : > { %480 = vperm.xlu2 %2528, %v322_v1   ;;  %405 = vperm.xlu0 %2526, %v307_v2   ;;  %v321_v12 = vld [vmem:[%s4522_s2 + $0xe8] sm:$0xff]  ;;  %v320_v13 = vld [vmem:[%s4522_s2 + $0xe0] sm:$0xff]  ;;  %v258_v14 = vld [vmem:[%s4521_s1 + $0x10] sm:$0xff]  ;;  %s2208_s12 = scalar_lea.hbm %s4525_s5, %s2467_s8 }
  0x18   : > { %s2445_s14 = sshll.u32 %s245_s13, 4  ;;  %v319_v15 = vld [vmem:[%s4522_s2 + $0xd8] sm:$0xff]  ;;  %v302_v16 = vld [vmem:[%s4522_s2 + $0x50] sm:$0xff]  ;;  %v301_v17 = vld [vmem:[%s4522_s2 + $0x48] sm:$0xff] }
  0x19   : > { %s251_s17 = scalar_lea.vmem %s4520_s0, %s2445_s14  ;;  %v259_v18 = vld [vmem:[%s4521_s1 + $0x18] sm:$0xff]  ;;  %v300_v19 = vld [vmem:[%s4522_s2 + $0x40] sm:$0xff]  ;;  %v318_v20 = vld [vmem:[%s4522_s2 + $0xd0] sm:$0xff]  ;;  %s2211_s14 = sshll.u32 %s2208_s12, 4  ;;  %s2212_s14 = int_to_ptr.hbm [resolvable:$true] %s2211_s14 }
  0x1a   : > { %v254_v5 = vld [vmem:[%s251_s17] sm:$0xff]  ;;  %v255_v6 = vld [vmem:[%s251_s17 + $0x8] sm:$0xff]  ;;  %v299_v24 = vld [vmem:[%s4522_s2 + $0x38] sm:$0xff]  ;;  %s240_s17 = sand.u32 1, %s2591_s19   ;;  %s2543_s15 = sshra.s32 %s2212_s14, 4  ;;  %s2544_s15 = int_to_ptr.hbm [resolvable:$true] %s2543_s15 }
  0x1b   : > { %632 = vmatpush.msra.mxu0 %v254_v5  ;;  %757 = vmatpush.msra.mxu1 %v255_v6  ;;  %v317_v21 = vld [vmem:[%s4522_s2 + $0xc8] sm:$0xff]  ;;  %v260_v22 = vld [vmem:[%s4521_s1 + $0x20] sm:$0xff]  ;;  %v298_v25 = vld [vmem:[%s4522_s2 + $0x30] sm:$0xff]  ;;  %s2466_s24 = smul.u32 576, %s240_s17  ;;  %s2195_s21 = scalar_lea.sflag [#allocation3], %s240_s17 }
  0x1c   : > { %2298 = vmatmul.msk.f32.vlgmr.msra.gmra.mxu0 %vm508_vm0, %v256_v4  ;;  %2334 = vmatmul.msk.f32.vlgmr.msra.gmra.mxu1 %vm508_vm0, %v256_v4  ;;  %v316_v23 = vld [vmem:[%s4522_s2 + $0xc0] sm:$0xff]  ;;  %v261_v26 = vld [vmem:[%s4521_s1 + $0x28] sm:$0xff]  ;;  %v315_v28 = vld [vmem:[%s4522_s2 + $0xb8] sm:$0xff]  ;;  %s2545_s16 = scalar_lea.hbm %s2544_s15, 576  ;;  %p2550_p1 = scmp.lt.s32.totalorder %s2544_s15, %s4525_s5 }
  0x1d   : > { %v297_v27 = vld [vmem:[%s4522_s2 + $0x28] sm:$0xff]  ;;  %v314_v29 = vld [vmem:[%s4522_s2 + $0xb0] sm:$0xff]  ;;  %v296_v32 = vld [vmem:[%s4522_s2 + $0x20] sm:$0xff]  ;;  %s3742_s10 = scalar_lea.vmem [#allocation2], %s2466_s24  ;;  %p2546_p12 = scmp.ne.s32.totalorder %s2544_s15, %s2545_s16 }
  0x1e   : > { %395 = vperm.xlu1 %2527, %v305_v7   ;;  %v262_v30 = vld [vmem:[%s4521_s1 + $0x30] sm:$0xff]  ;;  %v313_v31 = vld [vmem:[%s4522_s2 + $0xa8] sm:$0xff]  ;;  %v295_v33 = vld [vmem:[%s4522_s2 + $0x18] sm:$0xff]  ;;  %s2209_s13 = sshll.u32 %s3742_s10, 4  ;;  %p2551_p2 = scmp.lt.s32.totalorder %s2549_s27, %s2545_s16  ;;  %s2210_s13 = int_to_ptr.vmem [resolvable:$true] %s2209_s13 }
  0x1f   : > { %400 = vperm.xlu0 %2526, %v306_v8   ;;  %390 = vperm.xlu2 %2528, %v304_v9   ;;  %v263_v34 = vld [vmem:[%s4521_s1 + $0x38] sm:$0xff]  ;;  %v294_v35 = vld [vmem:[%s4522_s2 + $0x10] sm:$0xff]  ;;  %v312_v36 = vld [vmem:[%s4522_s2 + $0xa0] sm:$0xff]  ;;  %p2547_p13 = pnand %p2546_p12, %p2682_p4 }
  0x20   : > { %v311_v37 = vld [vmem:[%s4522_s2 + $0x98] sm:$0xff]  ;;  %v264_v38 = vld [vmem:[%s4521_s1 + $0x40] sm:$0xff]  ;;  %v293_v39 = vld [vmem:[%s4522_s2 + $0x8] sm:$0xff]  ;;  %p2552_p3 = por %p2551_p2, %p2550_p1 }
  0x21   : > { %v292_v40 = vld [vmem:[%s4522_s2] sm:$0xff]  ;;  %v310_v41 = vld [vmem:[%s4522_s2 + $0x90] sm:$0xff]  ;;  %v265_v42 = vld [vmem:[%s4521_s1 + $0x48] sm:$0xff]  ;;  %p2548_p0 = pneg %p2547_p13 }
  0x22   : > { %v309_v43 = vld [vmem:[%s4522_s2 + $0x88] sm:$0xff]  ;;  %v308_v44 = vld [vmem:[%s4522_s2 + $0x80] sm:$0xff]  ;;  %v266_v45 = vld [vmem:[%s4521_s1 + $0x50] sm:$0xff] }
  0x23   : > { %v326_v46 = vld [vmem:[%s4522_s2 + $0x110] sm:$0xff]  ;;  %v325_v47 = vld [vmem:[%s4522_s2 + $0x108] sm:$0xff]  ;;  %v267_v48 = vld [vmem:[%s4521_s1 + $0x58] sm:$0xff]  ;;  %p2553_p5 = pnand %p2552_p3, %p2548_p0 }
  0x24   : > { %2299 = vmatmul.msk.f32.gmra.mxu0 %vm508_vm0, %v257_v10  ;;  %2335 = vmatmul.msk.f32.gmra.mxu1 %vm508_vm0, %v257_v10  ;;  %v1047_v49 = vld [vmem:[%s4524_s4] sm:$0xff]  ;;  %v1048_v50 = vld [vmem:[%s4524_s4 + $0x8] sm:$0xff]  ;;  %v1050_v52 = vld [vmem:[%s4524_s4 + $0x18] sm:$0xff] }
  0x25   : > { %v268_v51 = vld [vmem:[%s4521_s1 + $0x60] sm:$0xff]  ;;  %v327_v54 = vld [vmem:[%s4522_s2 + $0x118] sm:$0xff]  ;;  %v269_v55 = vld [vmem:[%s4521_s1 + $0x68] sm:$0xff] }
  0x26   : > { %385 = vperm.xlu1 %2527, %v303_v11   ;;  %v1051_v53 = vld [vmem:[%s4524_s4 + $0x20] sm:$0xff]  ;;  %v1053_v56 = vld [vmem:[%s4524_s4 + $0x30] sm:$0xff]  ;;  %v1054_v57 = vld [vmem:[%s4524_s4 + $0x38] sm:$0xff] }
  0x27   : > { %475 = vperm.xlu0 %2526, %v321_v12   ;;  %470 = vperm.xlu2 %2528, %v320_v13   ;;  %v324_v58 = vld [vmem:[%s4522_s2 + $0x100] sm:$0xff]  ;;  %v270_v59 = vld [vmem:[%s4521_s1 + $0x70] sm:$0xff]  ;;  %v1056_v60 = vld [vmem:[%s4524_s4 + $0x48] sm:$0xff] }
  0x28   : > { %v1057_v61 = vld [vmem:[%s4524_s4 + $0x50] sm:$0xff]  ;;  %v271_v63 = vld [vmem:[%s4521_s1 + $0x78] sm:$0xff]  ;;  %v1059_v0 = vld [vmem:[%s4524_s4 + $0x60] sm:$0xff] }
  0x29   : > { %v1049_v62 = vld [vmem:[%s4524_s4 + $0x10] sm:$0xff]  ;;  %v1060_v1 = vld [vmem:[%s4524_s4 + $0x68] sm:$0xff]  ;;  %v272_v3 = vld [vmem:[%s4521_s1 + $0x80] sm:$0xff] }
  0x2a   : > { %v1052_v2 = vld [vmem:[%s4524_s4 + $0x28] sm:$0xff]  ;;  %v1062_v6 = vld [vmem:[%s4524_s4 + $0x78] sm:$0xff]  ;;  %v1063_v7 = vld [vmem:[%s4524_s4 + $0x80] sm:$0xff] }
  0x2b   : > { %v1055_v8 = vld [vmem:[%s4524_s4 + $0x40] sm:$0xff]  ;;  %v273_v9 = vld [vmem:[%s4521_s1 + $0x88] sm:$0xff]  ;;  %v1065_v12 = vld [vmem:[%s4524_s4 + $0x90] sm:$0xff] }
  0x2c   : > { %2300 = vmatmul.msk.f32.gmra.mxu0 %vm508_vm0, %v258_v14  ;;  %2336 = vmatmul.msk.f32.gmra.mxu1 %vm508_vm0, %v258_v14  ;;  %v1066_v13 = vld [vmem:[%s4524_s4 + $0x98] sm:$0xff] }
  0x2d   : > { %v1058_v14 = vld [vmem:[%s4524_s4 + $0x58] sm:$0xff] }
  0x2e   : > { %465 = vperm.xlu1 %2527, %v319_v15   ;;  %v274_v15 = vld [vmem:[%s4521_s1 + $0x90] sm:$0xff] }
  0x2f   : > { %380 = vperm.xlu0 %2526, %v302_v16   ;;  %375 = vperm.xlu2 %2528, %v301_v17  }
  0x34   : > { %2301 = vmatmul.msk.f32.gmra.mxu0 %vm508_vm0, %v259_v18  ;;  %2337 = vmatmul.msk.f32.gmra.mxu1 %vm508_vm0, %v259_v18  ;;  %v1068_v18 = vld [vmem:[%s4524_s4 + $0xa8] sm:$0xff] }
  0x36   : > { %370 = vperm.xlu1 %2527, %v300_v19   ;;  %v1069_v19 = vld [vmem:[%s4524_s4 + $0xb0] sm:$0xff] }
  0x37   : > { %460 = vperm.xlu0 %2526, %v318_v20   ;;  %455 = vperm.xlu2 %2528, %v317_v21   ;;  %v1061_v20 = vld [vmem:[%s4524_s4 + $0x70] sm:$0xff]  ;;  %v275_v21 = vld [vmem:[%s4521_s1 + $0x98] sm:$0xff] }
  0x3c   : > { %2302 = vmatmul.msk.f32.gmra.mxu0 %vm508_vm0, %v260_v22  ;;  %2338 = vmatmul.msk.f32.gmra.mxu1 %vm508_vm0, %v260_v22 }
  0x3e   : > { %450 = vperm.xlu1 %2527, %v316_v23  }
  0x3f   : > { %365 = vperm.xlu0 %2526, %v299_v24   ;;  %360 = vperm.xlu2 %2528, %v298_v25   ;;  %v1071_v24 = vld [vmem:[%s4524_s4 + $0xc0] sm:$0xff]  ;;  %v1072_v25 = vld [vmem:[%s4524_s4 + $0xc8] sm:$0xff] }
  0x44   : > { %2303 = vmatmul.msk.f32.gmra.mxu0 %vm508_vm0, %v261_v26  ;;  %2339 = vmatmul.msk.f32.gmra.mxu1 %vm508_vm0, %v261_v26  ;;  %v1064_v26 = vld [vmem:[%s4524_s4 + $0x88] sm:$0xff] }
  0x46   : > { %355 = vperm.xlu1 %2527, %v297_v27   ;;  %v276_v27 = vld [vmem:[%s4521_s1 + $0xa0] sm:$0xff] }
  0x47   : > { %445 = vperm.xlu0 %2526, %v315_v28   ;;  %440 = vperm.xlu2 %2528, %v314_v29  }
  0x4c   : > { %2304 = vmatmul.msk.f32.gmra.mxu0 %vm508_vm0, %v262_v30  ;;  %2340 = vmatmul.msk.f32.gmra.mxu1 %vm508_vm0, %v262_v30  ;;  %v1074_v30 = vld [vmem:[%s4524_s4 + $0xd8] sm:$0xff] }
  0x4e   : > { %435 = vperm.xlu1 %2527, %v313_v31   ;;  %v1075_v31 = vld [vmem:[%s4524_s4 + $0xe0] sm:$0xff] }
  0x4f   : > { %350 = vperm.xlu0 %2526, %v296_v32   ;;  %345 = vperm.xlu2 %2528, %v295_v33   ;;  %v1067_v32 = vld [vmem:[%s4524_s4 + $0xa0] sm:$0xff]  ;;  %v277_v33 = vld [vmem:[%s4521_s1 + $0xa8] sm:$0xff] }
  0x54   : > { %2305 = vmatmul.msk.f32.gmra.mxu0 %vm508_vm0, %v263_v34  ;;  %2341 = vmatmul.msk.f32.gmra.mxu1 %vm508_vm0, %v263_v34 }
  0x56   : > { %340 = vperm.xlu1 %2527, %v294_v35  }
  0x57   : > { %430 = vperm.xlu0 %2526, %v312_v36   ;;  %425 = vperm.xlu2 %2528, %v311_v37   ;;  %v1077_v36 = vld [vmem:[%s4524_s4 + $0xf0] sm:$0xff]  ;;  %v1078_v37 = vld [vmem:[%s4524_s4 + $0xf8] sm:$0xff] }
  0x5c   : > { %2306 = vmatmul.msk.f32.gmra.mxu0 %vm508_vm0, %v264_v38  ;;  %2342 = vmatmul.msk.f32.gmra.mxu1 %vm508_vm0, %v264_v38  ;;  %v1070_v38 = vld [vmem:[%s4524_s4 + $0xb8] sm:$0xff] }
  0x5e   : > { %420 = vperm.xlu1 %2527, %v310_v41  }
  0x5f   : > { %335 = vperm.xlu0 %2526, %v293_v39   ;;  %330 = vperm.xlu2 %2528, %v292_v40   ;;  %v278_v39 = vld [vmem:[%s4521_s1 + $0xb0] sm:$0xff] }
  0x64   : > { %2307 = vmatmul.msk.f32.gmra.mxu0 %vm508_vm0, %v265_v42  ;;  %2343 = vmatmul.msk.f32.gmra.mxu1 %vm508_vm0, %v265_v42  ;;  %v1080_v42 = vld [vmem:[%s4524_s4 + $0x108] sm:$0xff] }
  0x66   : > { %410 = vperm.xlu1 %2527, %v308_v44   ;;  %v1073_v44 = vld [vmem:[%s4524_s4 + $0xd0] sm:$0xff] }
  0x67   : > { %415 = vperm.xlu0 %2526, %v309_v43   ;;  %505 = vperm.xlu2 %2528, %v327_v54   ;;  %v1081_v43 = vld [vmem:[%s4524_s4 + $0x110] sm:$0xff] }
  0x6c   : > { %2308 = vmatmul.msk.f32.gmra.mxu0 %vm508_vm0, %v266_v45  ;;  %2344 = vmatmul.msk.f32.gmra.mxu1 %vm508_vm0, %v266_v45 }
  0x6e   : > { %495 = vperm.xlu1 %2527, %v325_v47  }
  0x6f   : > { %500 = vperm.xlu0 %2526, %v326_v46   ;;  %490 = vperm.xlu2 %2528, %v324_v58   ;;  %v279_v46 = vld [vmem:[%s4521_s1 + $0xb8] sm:$0xff]  ;;  %v281_v58 = vld [vmem:[%s4521_s1 + $0xc8] sm:$0xff] }
  0x74   : > { %2309 = vmatmul.msk.f32.gmra.mxu0 %vm508_vm0, %v267_v48  ;;  %2345 = vmatmul.msk.f32.gmra.mxu1 %vm508_vm0, %v267_v48 }
  0x76   : > { %1090 = vperm.xlu1 %2527, %v1048_v50   ;;  %v1076_v50 = vld [vmem:[%s4524_s4 + $0xe8] sm:$0xff] }
  0x77   : > { %1085 = vperm.xlu0 %2526, %v1047_v49   ;;  %1095 = vperm.xlu2 %2528, %v1049_v62   ;;  %v3061_v49 = vpop.permute.xlu2 %480  ;;  %v1082_v62 = vld [vmem:[%s4524_s4 + $0x118] sm:$0xff] }
  0x7c   : > { %2310 = vmatmul.msk.f32.gmra.mxu0 %vm508_vm0, %v268_v51  ;;  %2346 = vmatmul.msk.f32.gmra.mxu1 %vm508_vm0, %v268_v51 }
  0x7e   : > { %1105 = vperm.xlu1 %2527, %v1051_v53  }
  0x7f   : > { %1100 = vperm.xlu0 %2526, %v1050_v52   ;;  %1110 = vperm.xlu2 %2528, %v1052_v2   ;;  %v280_v52 = vld [vmem:[%s4521_s1 + $0xc0] sm:$0xff] }
  0x84   : > { %2311 = vmatmul.msk.f32.gmra.mxu0 %vm508_vm0, %v269_v55  ;;  %2347 = vmatmul.msk.f32.gmra.mxu1 %vm508_vm0, %v269_v55 }
  0x86   : > { %1120 = vperm.xlu1 %2527, %v1054_v57   ;;  %v3082_v57 = vpop.permute.xlu2 %390 }
  0x87   : > { %1115 = vperm.xlu0 %2526, %v1053_v56   ;;  %1125 = vperm.xlu2 %2528, %v1055_v8   ;;  %v1079_v56 = vld [vmem:[%s4524_s4 + $0x100] sm:$0xff] }
  0x88   : > { %v3068_v51 = vpop.permute.xlu1 %485 }
  0x89   : > { %v3052_v45 = vpop.permute.xlu0 %405 }
  0x8c   : > { %2312 = vmatmul.msk.f32.gmra.mxu0 %vm508_vm0, %v270_v59  ;;  %2348 = vmatmul.msk.f32.gmra.mxu1 %vm508_vm0, %v270_v59 }
  0x8e   : > { %1135 = vperm.xlu1 %2527, %v1057_v61  }
  0x8f   : > { %1130 = vperm.xlu0 %2526, %v1056_v60   ;;  %1140 = vperm.xlu2 %2528, %v1058_v14  }
  0x90   : > { %v396_v61 = vpop.permute.xlu1 %395 }
  0x91   : > { %v401_v55 = vpop.permute.xlu0 %400 }
  0x94   : > { %2313 = vmatmul.msk.f32.gmra.mxu0 %vm508_vm0, %v271_v63  ;;  %2349 = vmatmul.msk.f32.gmra.mxu1 %vm508_vm0, %v271_v63 }
  0x96   : > { %1150 = vperm.xlu1 %2527, %v1060_v1   ;;  %v282_v1 = vld [vmem:[%s4521_s1 + $0xd0] sm:$0xff] }
  0x97   : > { %1145 = vperm.xlu0 %2526, %v1059_v0   ;;  %1155 = vperm.xlu2 %2528, %v1061_v20   ;;  %v3098_v0 = vpop.permute.xlu2 %470 }
  0x99   : > { %v2929_v4 = vpop.f32.mrf.mxu0  ;;  %v2931_v5 = vpop.f32.mrf.mxu1 }
  0x9a   : > { %v3096_v63 = vpop.permute.xlu0 %475 }
  0x9c   : > { %2314 = vmatmul.msk.f32.gmra.mxu0 %vm508_vm0, %v272_v3  ;;  %2350 = vmatmul.msk.f32.gmra.mxu1 %vm508_vm0, %v272_v3 }
  0x9e   : > { %1165 = vperm.xlu1 %2527, %v1063_v7  }
  0x9f   : > { %1160 = vperm.xlu0 %2526, %v1062_v6   ;;  %1170 = vperm.xlu2 %2528, %v1064_v26   ;;  %v386_v6 = vpop.permute.xlu1 %385  ;;  %v3111_v8 = vpop.permute.xlu2 %375 }
  0xa1   : > { %v2947_v10 = vpop.f32.mrf.mxu0  ;;  %v2949_v11 = vpop.f32.mrf.mxu1 }
  0xa2   : > { %v3109_v7 = vpop.permute.xlu0 %380 }
  0xa4   : > { %2315 = vmatmul.msk.f32.gmra.mxu0 %vm508_vm0, %v273_v9  ;;  %2351 = vmatmul.msk.f32.gmra.mxu1 %vm508_vm0, %v273_v9  ;;  %v283_v9 = vld [vmem:[%s4521_s1 + $0xd8] sm:$0xff] }
  0xa6   : > { %1180 = vperm.xlu1 %2527, %v1066_v13  }
  0xa7   : > { %1175 = vperm.xlu0 %2526, %v1065_v12   ;;  %1185 = vperm.xlu2 %2528, %v1067_v32   ;;  %v3118_v14 = vpop.permute.xlu1 %465  ;;  %v286_v32 = vld [vmem:[%s4521_s1 + $0xf0] sm:$0xff] }
  0xa9   : > { %v2965_v16 = vpop.f32.mrf.mxu0  ;;  %v2967_v17 = vpop.f32.mrf.mxu1 }
  0xac   : > { %2316 = vmatmul.msk.f32.gmra.mxu0 %vm508_vm0, %v274_v15  ;;  %2352 = vmatmul.msk.f32.gmra.mxu1 %vm508_vm0, %v274_v15  ;;  %v3120_v15 = vpop.permute.xlu0 %460 }
  0xae   : > { %1195 = vperm.xlu1 %2527, %v1069_v19  }
  0xaf   : > { %1190 = vperm.xlu0 %2526, %v1068_v18   ;;  %1200 = vperm.xlu2 %2528, %v1070_v38   ;;  %v284_v18 = vld [vmem:[%s4521_s1 + $0xe0] sm:$0xff] }
  0xb1   : > { %v2983_v22 = vpop.f32.mrf.mxu0  ;;  %v2985_v23 = vpop.f32.mrf.mxu1 }
  0xb4   : > { %2317 = vmatmul.msk.f32.gmra.mxu0 %vm508_vm0, %v275_v21  ;;  %2353 = vmatmul.msk.f32.gmra.mxu1 %vm508_vm0, %v275_v21  ;;  %v3125_v21 = vpop.permute.xlu2 %455 }
  0xb6   : > { %1210 = vperm.xlu1 %2527, %v1072_v25   ;;  %v285_v25 = vld [vmem:[%s4521_s1 + $0xe8] sm:$0xff] }
  0xb7   : > { %1205 = vperm.xlu0 %2526, %v1071_v24   ;;  %1215 = vperm.xlu2 %2528, %v1073_v44   ;;  %v3129_v24 = vpop.permute.xlu1 %370 }
  0xb9   : > { %v3001_v28 = vpop.f32.mrf.mxu0  ;;  %v3003_v29 = vpop.f32.mrf.mxu1 }
  0xbc   : > { %2318 = vmatmul.msk.f32.gmra.mxu0 %vm508_vm0, %v276_v27  ;;  %2354 = vmatmul.msk.f32.gmra.mxu1 %vm508_vm0, %v276_v27 }
  0xbe   : > { %1225 = vperm.xlu1 %2527, %v1075_v31   ;;  %v3138_v31 = vpop.permute.xlu2 %360 }
  0xbf   : > { %1220 = vperm.xlu0 %2526, %v1074_v30   ;;  %1230 = vperm.xlu2 %2528, %v1076_v50   ;;  %v3134_v30 = vpop.permute.xlu0 %365 }
  0xc1   : > { %v3019_v34 = vpop.f32.mrf.mxu0  ;;  %v3021_v35 = vpop.f32.mrf.mxu1 }
  0xc4   : > { %2319 = vmatmul.msk.f32.gmra.mxu0 %vm508_vm0, %v277_v33  ;;  %2355 = vmatmul.msk.f32.gmra.mxu1 %vm508_vm0, %v277_v33 }
  0xc6   : > { %1240 = vperm.xlu1 %2527, %v1078_v37   ;;  %v3143_v37 = vpop.permute.xlu1 %450 }
  0xc7   : > { %1235 = vperm.xlu0 %2526, %v1077_v36   ;;  %1245 = vperm.xlu2 %2528, %v1079_v56   ;;  %v3147_v38 = vpop.permute.xlu0 %445 }
  0xc9   : > { %v3037_v40 = vpop.f32.mrf.mxu0  ;;  %v3039_v41 = vpop.f32.mrf.mxu1 }
  0xcc   : > { %2320 = vmatmul.msk.f32.gmra.mxu0 %vm508_vm0, %v278_v39  ;;  %2356 = vmatmul.msk.f32.gmra.mxu1 %vm508_vm0, %v278_v39  ;;  %v3149_v39 = vpop.permute.xlu2 %440 }
  0xce   : > { %1255 = vperm.xlu1 %2527, %v1081_v43  }
  0xcf   : > { %1250 = vperm.xlu0 %2526, %v1080_v42   ;;  %1260 = vperm.xlu2 %2528, %v1082_v62   ;;  %v287_v42 = vld [vmem:[%s4521_s1 + $0xf8] sm:$0xff]  ;;  %v3158_v62 = vpop.permute.xlu1 %355 }
  0xd1   : > { %v3057_v47 = vpop.f32.mrf.mxu0  ;;  %v3059_v48 = vpop.f32.mrf.mxu1 }
  0xd4   : > { %2321 = vmatmul.msk.f32.gmra.mxu0 %vm508_vm0, %v279_v46  ;;  %2357 = vmatmul.msk.f32.gmra.mxu1 %vm508_vm0, %v279_v46 }
  0xd9   : > { %v3073_v53 = vpop.f32.mrf.mxu0  ;;  %v3075_v54 = vpop.f32.mrf.mxu1 }
  0xdc   : > { %2322 = vmatmul.msk.f32.gmra.mxu0 %vm508_vm0, %v280_v52  ;;  %2358 = vmatmul.msk.f32.gmra.mxu1 %vm508_vm0, %v280_v52 }
  0xe1   : > { %v3087_v59 = vpop.f32.mrf.mxu0  ;;  %v3089_v60 = vpop.f32.mrf.mxu1 }
  0xe4   : > { %2323 = vmatmul.msk.f32.gmra.mxu0 %vm508_vm0, %v281_v58  ;;  %2359 = vmatmul.msk.f32.gmra.mxu1 %vm508_vm0, %v281_v58 }
  0xe9   : > { %v3103_v2 = vpop.f32.mrf.mxu0  ;;  %v3105_v3 = vpop.f32.mrf.mxu1 }
  0xec   : > { %2324 = vmatmul.msk.f32.gmra.mxu0 %vm508_vm0, %v282_v1  ;;  %2360 = vmatmul.msk.f32.gmra.mxu1 %vm508_vm0, %v282_v1 }
  0xf1   : > { %v667_v12 = vpop.f32.mrf.mxu0  ;;  %v792_v13 = vpop.f32.mrf.mxu1 }
  0xf4   : > { %2325 = vmatmul.msk.f32.gmra.mxu0 %vm508_vm0, %v283_v9  ;;  %2361 = vmatmul.msk.f32.gmra.mxu1 %vm508_vm0, %v283_v9 }
  0xf9   : > { %v670_v19 = vpop.f32.mrf.mxu0  ;;  %v795_v20 = vpop.f32.mrf.mxu1 }
  0xfc   : > { %2326 = vmatmul.msk.f32.gmra.mxu0 %vm508_vm0, %v284_v18  ;;  %2362 = vmatmul.msk.f32.gmra.mxu1 %vm508_vm0, %v284_v18 }
 0x101   : > { %v673_v26 = vpop.f32.mrf.mxu0  ;;  %v798_v27 = vpop.f32.mrf.mxu1 }
 0x102   : > { %v799_v58 = vadd.f32 %v798_v27, %v396_v61  ;;  %v674_v1 = vadd.f32 %v673_v26, %v396_v61  ;;  %v793_v27 = vadd.f32 %v792_v13, %v386_v6  ;;  %v790_v26 = vadd.f32 %v3105_v3, %v3109_v7 }
 0x103   : > { %v662_v3 = vadd.f32 %v3087_v59, %v3111_v8 }
 0x104   : > { %2327 = vmatmul.msk.f32.gmra.mxu0 %vm508_vm0, %v285_v25  ;;  %2363 = vmatmul.msk.f32.gmra.mxu1 %vm508_vm0, %v285_v25  ;;  %v796_v25 = vadd.f32 %v795_v20, %v3082_v57  ;;  %v893_v61 = vmax.f32 %v674_v1, 0.0  ;;  %v288_v20 = vld [vmem:[%s4521_s1 + $0x100] sm:$0xff] }
 0x105   : > { %v885_v1 = vmax.f32 %v662_v3, 0.0 }
 0x106   : > { %v892_v13 = vmax.f32 %v796_v25, 0.0 }
 0x109   : > { %v676_v33 = vpop.f32.mrf.mxu0  ;;  %v801_v36 = vpop.f32.mrf.mxu1 }
 0x10a   : > { %v802_v43 = vadd.f32 %v801_v36, %v401_v55  ;;  %v677_v50 = vadd.f32 %v676_v33, %v401_v55  ;;  %v3161_v36 = vpop.permute.xlu0 %350  ;;  %v671_v55 = vadd.f32 %v670_v19, %v3082_v57  ;;  %v894_v33 = vmax.f32 %v799_v58, 0.0 }
 0x10b   : > { %v781_v58 = vadd.f32 %v3059_v48, %v3134_v30 }
 0x10c   : > { %2328 = vmatmul.msk.f32.gmra.mxu0 %vm508_vm0, %v286_v32  ;;  %2364 = vmatmul.msk.f32.gmra.mxu1 %vm508_vm0, %v286_v32  ;;  %v896_v32 = vmax.f32 %v802_v43, 0.0  ;;  %v665_v43 = vadd.f32 %v3103_v2, %v3109_v7  ;;  %v888_v2 = vmax.f32 %v790_v26, 0.0  ;;  %v3183_v7 = vpop.permute.xlu1 %435 }
 0x111   : > { %v679_v44 = vpop.f32.mrf.mxu0  ;;  %v804_v46 = vpop.f32.mrf.mxu1 }
 0x112   : > { %v680_v52 = vadd.f32 %v679_v44, %v3052_v45  ;;  %v805_v56 = vadd.f32 %v804_v46, %v3052_v45  ;;  %v895_v45 = vmax.f32 %v677_v50, 0.0  ;;  %v3164_v44 = vpop.permute.xlu2 %345  ;;  %v890_v46 = vmax.f32 %v793_v27, 0.0 }
 0x113   : > { %v647_v27 = vadd.f32 %v3001_v28, %v3161_v36  ;;  %v290_v28 = vld [vmem:[%s4521_s1 + $0x110] sm:$0xff] }
 0x114   : > { %2329 = vmatmul.msk.f32.gmra.mxu0 %vm508_vm0, %v287_v42  ;;  %2365 = vmatmul.msk.f32.gmra.mxu1 %vm508_vm0, %v287_v42  ;;  %v897_v9 = vmax.f32 %v680_v52, 0.0  ;;  %v898_v18 = vmax.f32 %v805_v56, 0.0  ;;  %v668_v42 = vadd.f32 %v667_v12, %v386_v6  ;;  %v891_v6 = vmax.f32 %v671_v55, 0.0 }
 0x115   : > { %v787_v12 = vadd.f32 %v3089_v60, %v3111_v8  ;;  %v784_v52 = vadd.f32 %v3075_v54, %v3129_v24  ;;  %v887_v60 = vmax.f32 %v665_v43, 0.0  ;;  %v659_v56 = vadd.f32 %v3073_v53, %v3129_v24  ;;  %v3189_v8 = vpop.permute.xlu0 %430  ;;  %v289_v53 = vld [vmem:[%s4521_s1 + $0x108] sm:$0xff] }
 0x116   : > { %1372 = vmatpush.msrb.mxu0 %v897_v9  ;;  %2446 = vmatpush.msra.mxu2 %v897_v9  ;;  %v889_v50 = vmax.f32 %v668_v42, 0.0  ;;  %v656_v9 = vadd.f32 %v3057_v47, %v3134_v30  ;;  %v778_v24 = vadd.f32 %v3039_v41, %v3138_v31  ;;  %v653_v47 = vadd.f32 %v3037_v40, %v3138_v31  ;;  %v341_v42 = vpop.permute.xlu1 %340 }
 0x117   : > { %1747 = vmatpush.msrb.mxu1 %v898_v18  ;;  %v886_v59 = vmax.f32 %v787_v12, 0.0  ;;  %v884_v48 = vmax.f32 %v784_v52, 0.0  ;;  %v883_v30 = vmax.f32 %v659_v56, 0.0  ;;  %v882_v55 = vmax.f32 %v781_v58, 0.0  ;;  %v942_v56 = vld [vmem:[%s4523_s3 + $0x18] sm:$0xff] }
 0x118   : > { %1373 = vmatpush.msrb.mxu0 %v895_v45  ;;  %2447 = vmatpush.msra.mxu2 %v895_v45  ;;  %v650_v41 = vadd.f32 %v3019_v34, %v3158_v62  ;;  %v881_v45 = vmax.f32 %v656_v9, 0.0  ;;  %v772_v40 = vadd.f32 %v3003_v29, %v3161_v36  ;;  %v880_v31 = vmax.f32 %v778_v24, 0.0  ;;  %v945_v9 = vld [vmem:[%s4523_s3 + $0x30] sm:$0xff] }
 0x119   : > { %1748 = vmatpush.msrb.mxu1 %v896_v32  ;;  %v3171_v57 = vpop.f32.mrf.mxu0  ;;  %v3173_v19 = vpop.f32.mrf.mxu1  ;;  %v775_v32 = vadd.f32 %v3021_v35, %v3158_v62  ;;  %v879_v35 = vmax.f32 %v653_v47, 0.0  ;;  %v644_v62 = vadd.f32 %v2983_v22, %v3164_v44  ;;  %v766_v36 = vadd.f32 %v2967_v17, %v341_v42 }
 0x11a   : > { %1374 = vmatpush.msrb.mxu0 %v893_v61  ;;  %2448 = vmatpush.msra.mxu2 %v893_v61  ;;  %v3204_v25 = vpop.permute.xlu2 %425  ;;  %v876_v26 = vmax.f32 %v772_v40, 0.0  ;;  %v875_v22 = vmax.f32 %v647_v27, 0.0  ;;  %v957_v27 = vld [vmem:[%s4523_s3 + $0x90] sm:$0xff] }
 0x11b   : > { %1749 = vmatpush.msrb.mxu1 %v894_v33  ;;  %v769_v33 = vadd.f32 %v2985_v23, %v3164_v44  ;;  %v878_v34 = vmax.f32 %v775_v32, 0.0  ;;  %v873_v17 = vmax.f32 %v644_v62, 0.0  ;;  %v951_v32 = vld [vmem:[%s4523_s3 + $0x60] sm:$0xff] }
 0x11c   : > { %2330 = vmatmul.msk.f32.gmra.mxu0 %vm508_vm0, %v288_v20  ;;  %2366 = vmatmul.msk.f32.gmra.mxu1 %vm508_vm0, %v288_v20  ;;  %v877_v20 = vmax.f32 %v650_v41, 0.0 }
 0x11d   : > { %1375 = vmatpush.msrb.mxu0 %v891_v6  ;;  %2449 = vmatpush.msra.mxu2 %v891_v6  ;;  %v336_v23 = vpop.permute.xlu0 %335  ;;  %v874_v43 = vmax.f32 %v769_v33, 0.0 }
 0x11e   : > { %1750 = vmatpush.msrb.mxu1 %v892_v13  ;;  %v641_v13 = vadd.f32 %v2965_v16, %v341_v42  ;;  %v763_v44 = vadd.f32 %v2949_v11, %v336_v23  ;;  %v638_v12 = vadd.f32 %v2947_v10, %v336_v23  ;;  %v960_v42 = vld [vmem:[%s4523_s3 + $0xa8] sm:$0xff]  ;;  %v966_v23 = vld [vmem:[%s4523_s3 + $0xd8] sm:$0xff] }
 0x11f   : > { %1376 = vmatpush.msrb.mxu0 %v889_v50  ;;  %2450 = vmatpush.msra.mxu2 %v889_v50 }
 0x120   : > { %1751 = vmatpush.msrb.mxu1 %v890_v46  ;;  %v872_v46 = vmax.f32 %v766_v36, 0.0  ;;  %v871_v3 = vmax.f32 %v641_v13, 0.0  ;;  %v870_v50 = vmax.f32 %v763_v44, 0.0  ;;  %v869_v52 = vmax.f32 %v638_v12, 0.0 }
 0x121   : > { %1377 = vmatpush.msrb.mxu0 %v887_v60  ;;  %2451 = vmatpush.msra.mxu2 %v887_v60  ;;  %v3195_v54 = vpop.f32.mrf.mxu0  ;;  %v3197_v18 = vpop.f32.mrf.mxu1  ;;  %v291_v60 = vld [vmem:[%s4521_s1 + $0x118] sm:$0xff] }
 0x122   : > { %1752 = vmatpush.msrb.mxu1 %v888_v2  ;;  %v331_v6 = vpop.permute.xlu2 %330 }
 0x123   : > { %1378 = vmatpush.msrb.mxu0 %v885_v1  ;;  %2452 = vmatpush.msra.mxu2 %v885_v1  ;;  %v760_v16 = vadd.f32 %v2931_v5, %v331_v6  ;;  %v635_v11 = vadd.f32 %v2929_v4, %v331_v6  ;;  %v939_v1 = vld [vmem:[%s4523_s3] sm:$0xff]  ;;  %v972_v6 = vld [vmem:[%s4523_s3 + $0x108] sm:$0xff] }
 0x124   : > { %1753 = vmatpush.msrb.mxu1 %v886_v59  ;;  %2331 = vmatmul.msk.f32.gmra.mxu0 %vm508_vm0, %v289_v53 }
 0x125   : > { %2367 = vmatmul.msk.f32.gmra.mxu1 %vm508_vm0, %v289_v53  ;;  %1379 = vmatpush.msrb.mxu0 %v883_v30  ;;  %v868_v5 = vmax.f32 %v760_v16, 0.0  ;;  %v867_v4 = vmax.f32 %v635_v11, 0.0 }
 0x126   : > { %2453 = vmatpush.msra.mxu2 %v883_v30  ;;  %1754 = vmatpush.msrb.mxu1 %v884_v48  ;;  %v948_v48 = vld [vmem:[%s4523_s3 + $0x48] sm:$0xff] }
 0x127   : > { %1380 = vmatpush.msrb.mxu0 %v881_v45 }
 0x128   : > { %2454 = vmatpush.msra.mxu2 %v881_v45  ;;  %1755 = vmatpush.msrb.mxu1 %v882_v55  ;;  %v954_v45 = vld [vmem:[%s4523_s3 + $0x78] sm:$0xff] }
 0x129   : > { %1381 = vmatpush.msrb.mxu0 %v879_v35  ;;  %v3222_v29 = vpop.f32.mrf.mxu0  ;;  %v3224_v61 = vpop.f32.mrf.mxu1 }
 0x12a   : > { %2455 = vmatpush.msra.mxu2 %v879_v35  ;;  %1756 = vmatpush.msrb.mxu1 %v880_v31 }
 0x12b   : > { %1382 = vmatpush.msrb.mxu0 %v877_v20 }
 0x12c   : > { %2456 = vmatpush.msra.mxu2 %v877_v20  ;;  %1757 = vmatpush.msrb.mxu1 %v878_v34  ;;  %v963_v20 = vld [vmem:[%s4523_s3 + $0xc0] sm:$0xff] }
 0x12d   : > { %2332 = vmatmul.msk.f32.gmra.mxu0 %vm508_vm0, %v290_v28  ;;  %2368 = vmatmul.msk.f32.gmra.mxu1 %vm508_vm0, %v290_v28 }
 0x12e   : > { %1383 = vmatpush.msrb.mxu0 %v875_v22  ;;  %2457 = vmatpush.msra.mxu2 %v875_v22  ;;  %v969_v22 = vld [vmem:[%s4523_s3 + $0xf0] sm:$0xff] }
 0x12f   : > { %1758 = vmatpush.msrb.mxu1 %v876_v26 }
 0x130   : > { %1384 = vmatpush.msrb.mxu0 %v873_v17  ;;  %2458 = vmatpush.msra.mxu2 %v873_v17 }
 0x131   : > { %1759 = vmatpush.msrb.mxu1 %v874_v43  ;;  %v3237_v2 = vpop.f32.mrf.mxu0  ;;  %v3239_v10 = vpop.f32.mrf.mxu1 }
 0x132   : > { %1385 = vmatpush.msrb.mxu0 %v871_v3  ;;  %2459 = vmatpush.msra.mxu2 %v871_v3 }
 0x133   : > { %1760 = vmatpush.msrb.mxu1 %v872_v46  ;;  %v975_v46 = vld [vmem:[%s4523_s3 + $0x120] sm:$0xff] }
 0x134   : > { %1386 = vmatpush.msrb.mxu0 %v869_v52  ;;  %2460 = vmatpush.msra.mxu2 %v869_v52 }
 0x135   : > { %1761 = vmatpush.msrb.mxu1 %v870_v50  ;;  %2333 = vmatmul.msk.f32.gmra.mxu0 %vm508_vm0, %v291_v60 }
 0x136   : > { %2369 = vmatmul.msk.f32.gmra.mxu1 %vm508_vm0, %v291_v60  ;;  %1387 = vmatpush.msrb.mxu0 %v867_v4 }
 0x137   : > { %2461 = vmatpush.msra.mxu2 %v867_v4  ;;  %1762 = vmatpush.msrb.mxu1 %v868_v5 }
 0x138   : > { %1391 = vmatmul.f32.vlgmr.msra.gmra.mxu2 %v942_v56 }
 0x139   : > { %v3249_v59 = vpop.f32.mrf.mxu0  ;;  %v3251_v58 = vpop.f32.mrf.mxu1 }
 0x13d   : > { %1388 = vmatmul.f32.vlgmr.msrb.gmra.mxu0 %v939_v1 }
 0x13e   : > { %1763 = vmatmul.f32.vlgmr.msrb.gmra.mxu1 %v939_v1 }
 0x140   : > { %1394 = vmatmul.f32.gmra.mxu2 %v945_v9 }
 0x141   : > { %v3259_v53 = vpop.f32.mrf.mxu0  ;;  %v3261_v24 = vpop.f32.mrf.mxu1 }
 0x146   : > { %1766 = vmatmul.f32.gmra.mxu1 %v942_v56  ;;  %v978_v56 = vld [vmem:[%s4523_s3 + $0x138] sm:$0xff] }
 0x148   : > { %1397 = vmatmul.f32.gmra.mxu2 %v948_v48 }
 0x149   : > { %v3266_v47 = vpop.f32.mrf.mxu0  ;;  %v3268_v30 = vpop.f32.mrf.mxu1 }
 0x14e   : > { %1769 = vmatmul.f32.gmra.mxu1 %v945_v9 }
 0x150   : > { %1400 = vmatmul.f32.gmra.mxu2 %v951_v32 }
 0x151   : > { %v3273_v55 = vpop.f32.mrf.mxu0  ;;  %v3275_v41 = vpop.f32.mrf.mxu1 }
 0x156   : > { %1772 = vmatmul.f32.gmra.mxu1 %v948_v48 }
 0x158   : > { %1403 = vmatmul.f32.gmra.mxu2 %v954_v45 }
 0x159   : > { %v3280_v40 = vpop.f32.mrf.mxu0  ;;  %v3282_v31 = vpop.f32.mrf.mxu1 }
 0x15e   : > { %1775 = vmatmul.f32.gmra.mxu1 %v951_v32 }
 0x160   : > { %1406 = vmatmul.f32.gmra.mxu2 %v957_v27 }
 0x161   : > { %v3287_v35 = vpop.f32.mrf.mxu0  ;;  %v3289_v33 = vpop.f32.mrf.mxu1 }
 0x166   : > { %1778 = vmatmul.f32.gmra.mxu1 %v954_v45 }
 0x168   : > { %1409 = vmatmul.f32.gmra.mxu2 %v960_v42 }
 0x169   : > { %v712_v34 = vpop.f32.mrf.mxu0  ;;  %v837_v62 = vpop.f32.mrf.mxu1 }
 0x16e   : > { %1781 = vmatmul.f32.gmra.mxu1 %v957_v27 }
 0x170   : > { %1412 = vmatmul.f32.gmra.mxu2 %v963_v20 }
 0x171   : > { %v715_v28 = vpop.f32.mrf.mxu0  ;;  %v840_v36 = vpop.f32.mrf.mxu1 }
 0x176   : > { %1784 = vmatmul.f32.gmra.mxu1 %v960_v42 }
 0x178   : > { %1415 = vmatmul.f32.gmra.mxu2 %v966_v23 }
 0x179   : > { %v718_v26 = vpop.f32.mrf.mxu0  ;;  %v843_v13 = vpop.f32.mrf.mxu1 }
 0x17a   : > { %v719_v48 = vadd.f32 %v718_v26, %v3098_v0  ;;  %v844_v32 = vadd.f32 %v843_v13, %v3098_v0  ;;  %v713_v26 = vadd.f32 %v712_v34, %v3120_v15  ;;  %v838_v0 = vadd.f32 %v837_v62, %v3120_v15 }
 0x17b   : > { %v707_v15 = vadd.f32 %v3280_v40, %v3143_v37  ;;  %v832_v62 = vadd.f32 %v3282_v31, %v3143_v37  ;;  %v701_v31 = vadd.f32 %v3266_v47, %v3149_v39 }
 0x17c   : > { %v923_v13 = vmax.f32 %v719_v48, 0.0  ;;  %v506_v48 = vpop.permute.xlu2 %505 }
 0x17e   : > { %1787 = vmatmul.f32.gmra.mxu1 %v963_v20 }
 0x180   : > { %1418 = vmatmul.f32.gmra.mxu2 %v969_v22 }
 0x181   : > { %v721_v44 = vpop.f32.mrf.mxu0  ;;  %v846_v43 = vpop.f32.mrf.mxu1 }
 0x182   : > { %v722_v5 = vadd.f32 %v721_v44, %v3096_v63  ;;  %v847_v4 = vadd.f32 %v846_v43, %v3096_v63  ;;  %v841_v63 = vadd.f32 %v840_v36, %v3118_v14  ;;  %v3335_v36 = vld [vmem:[%s4523_s3 + $0x150] sm:$0xff]  ;;  %v704_v43 = vadd.f32 %v3273_v55, %v3147_v38 }
 0x183   : > { %v915_v55 = vmax.f32 %v707_v15, 0.0 }
 0x184   : > { %v925_v27 = vmax.f32 %v722_v5, 0.0  ;;  %v926_v42 = vmax.f32 %v847_v4, 0.0  ;;  %v922_v44 = vmax.f32 %v841_v63, 0.0  ;;  %v913_v47 = vmax.f32 %v704_v43, 0.0 }
 0x186   : > { %1790 = vmatmul.f32.gmra.mxu1 %v966_v23 }
 0x188   : > { %1421 = vmatmul.f32.gmra.mxu2 %v972_v6 }
 0x189   : > { %v724_v12 = vpop.f32.mrf.mxu0  ;;  %v849_v17 = vpop.f32.mrf.mxu1 }
 0x18a   : > { %v725_v11 = vadd.f32 %v724_v12, %v3061_v49  ;;  %v850_v50 = vadd.f32 %v849_v17, %v3061_v49 }
 0x18c   : > { %v927_v49 = vmax.f32 %v725_v11, 0.0  ;;  %v928_v45 = vmax.f32 %v850_v50, 0.0  ;;  %v692_v50 = vadd.f32 %v3237_v2, %v3204_v25 }
 0x18e   : > { %1793 = vmatmul.f32.gmra.mxu1 %v969_v22  ;;  %v924_v22 = vmax.f32 %v844_v32, 0.0  ;;  %v905_v32 = vmax.f32 %v692_v50, 0.0 }
 0x190   : > { %1424 = vmatmul.f32.gmra.mxu2 %v975_v46 }
 0x191   : > { %v727_v16 = vpop.f32.mrf.mxu0  ;;  %v852_v3 = vpop.f32.mrf.mxu1 }
 0x192   : > { %v853_v52 = vadd.f32 %v852_v3, %v3068_v51  ;;  %v728_v60 = vadd.f32 %v727_v16, %v3068_v51  ;;  %v716_v51 = vadd.f32 %v715_v28, %v3118_v14  ;;  %v710_v28 = vadd.f32 %v3287_v35, %v3125_v21  ;;  %v3361_v3 = vld [vmem:[%s4523_s3 + $0x168] sm:$0xff] }
 0x193   : > { %v835_v14 = vadd.f32 %v3289_v33, %v3125_v21  ;;  %v919_v35 = vmax.f32 %v713_v26, 0.0  ;;  %v920_v21 = vmax.f32 %v838_v0, 0.0  ;;  %v421_v33 = vpop.permute.xlu1 %420  ;;  %v916_v16 = vmax.f32 %v832_v62, 0.0  ;;  %v491_v62 = vpop.permute.xlu2 %490 }
 0x194   : > { %v929_v1 = vmax.f32 %v728_v60, 0.0  ;;  %v930_v9 = vmax.f32 %v853_v52, 0.0  ;;  %v921_v34 = vmax.f32 %v716_v51, 0.0  ;;  %v917_v12 = vmax.f32 %v710_v28, 0.0 }
 0x195   : > { %v918_v40 = vmax.f32 %v835_v14, 0.0  ;;  %v817_v52 = vadd.f32 %v3239_v10, %v3204_v25  ;;  %v987_v10 = vld [vmem:[%s4523_s3 + $0x180] sm:$0xff] }
 0x196   : > { %1796 = vmatmul.f32.gmra.mxu1 %v972_v6  ;;  %1497 = vmatpush.msra.mxu3 %v929_v1  ;;  %v829_v6 = vadd.f32 %v3275_v41, %v3147_v38  ;;  %v698_v38 = vadd.f32 %v3259_v53, %v3183_v7  ;;  %v823_v41 = vadd.f32 %v3261_v24, %v3183_v7  ;;  %v911_v53 = vmax.f32 %v701_v31, 0.0  ;;  %v416_v24 = vpop.permute.xlu0 %415 }
 0x197   : > { %1872 = vmatpush.msrb.mxu2 %v930_v9  ;;  %v686_v2 = vadd.f32 %v3195_v54, %v416_v24  ;;  %v811_v25 = vadd.f32 %v3197_v18, %v416_v24 }
 0x198   : > { %1427 = vmatmul.f32.gmra.mxu2 %v978_v56  ;;  %1498 = vmatpush.msra.mxu3 %v927_v49  ;;  %v914_v11 = vmax.f32 %v829_v6, 0.0  ;;  %v909_v60 = vmax.f32 %v698_v38, 0.0 }
 0x199   : > { %1873 = vmatpush.msrb.mxu2 %v928_v45  ;;  %v3322_v20 = vpop.f32.mrf.mxu0  ;;  %v3324_v23 = vpop.f32.mrf.mxu1  ;;  %v901_v18 = vmax.f32 %v686_v2, 0.0  ;;  %v902_v51 = vmax.f32 %v811_v25, 0.0  ;;  %v3506_v2 = vld [vmem:[%s4523_s3 + $0x98] sm:$0xff]  ;;  %v3511_v25 = vld [vmem:[%s4523_s3 + $0x88] sm:$0xff] }
 0x19a   : > { %1499 = vmatpush.msra.mxu3 %v925_v27  ;;  %v856_v43 = vadd.f32 %v3324_v23, %v491_v62  ;;  %v993_v23 = vld [vmem:[%s4523_s3 + $0x1b0] sm:$0xff] }
 0x19b   : > { %1874 = vmatpush.msrb.mxu2 %v926_v42  ;;  %v411_v4 = vpop.permute.xlu1 %410 }
 0x19c   : > { %1500 = vmatpush.msra.mxu3 %v923_v13  ;;  %v808_v49 = vadd.f32 %v3173_v19, %v411_v4 }
 0x19d   : > { %1875 = vmatpush.msrb.mxu2 %v924_v22 }
 0x19e   : > { %1799 = vmatmul.f32.gmra.mxu1 %v975_v46  ;;  %1501 = vmatpush.msra.mxu3 %v921_v34  ;;  %v826_v46 = vadd.f32 %v3268_v30, %v3149_v39  ;;  %v695_v39 = vadd.f32 %v3249_v59, %v3189_v8  ;;  %v820_v30 = vadd.f32 %v3251_v58, %v3189_v8  ;;  %v910_v59 = vmax.f32 %v823_v41, 0.0  ;;  %v501_v63 = vpop.permute.xlu0 %500  ;;  %v996_v41 = vld [vmem:[%s4523_s3 + $0x1c8] sm:$0xff] }
 0x19f   : > { %1876 = vmatpush.msrb.mxu2 %v922_v44  ;;  %v689_v8 = vadd.f32 %v3222_v29, %v421_v33  ;;  %v814_v58 = vadd.f32 %v3224_v61, %v421_v33  ;;  %v906_v29 = vmax.f32 %v817_v52, 0.0  ;;  %v683_v61 = vadd.f32 %v3171_v57, %v411_v4  ;;  %v3385_v57 = vld [vmem:[%s4523_s3 + $0x8] sm:$0xff]  ;;  %v1002_v52 = vld [vmem:[%s4523_s3 + $0x1f8] sm:$0xff] }
 0x1a0   : > { %1430 = vmatmul.f32.gmra.mxu2 %v3335_v36  ;;  %1502 = vmatpush.msra.mxu3 %v919_v35  ;;  %v912_v7 = vmax.f32 %v826_v46, 0.0  ;;  %v907_v1 = vmax.f32 %v695_v39, 0.0  ;;  %v908_v9 = vmax.f32 %v820_v30, 0.0  ;;  %v900_v0 = vmax.f32 %v808_v49, 0.0  ;;  %v999_v30 = vld [vmem:[%s4523_s3 + $0x1e0] sm:$0xff] }
 0x1a1   : > { %1877 = vmatpush.msrb.mxu2 %v920_v21  ;;  %v3346_v17 = vpop.f32.mrf.mxu0  ;;  %v903_v45 = vmax.f32 %v689_v8, 0.0  ;;  %v904_v54 = vmax.f32 %v814_v58, 0.0  ;;  %v899_v26 = vmax.f32 %v683_v61, 0.0  ;;  %v731_v21 = vadd.f32 %v3322_v20, %v491_v62  ;;  %v1005_v8 = vld [vmem:[%s4523_s3 + $0x210] sm:$0xff]  ;;  %v3486_v58 = vld [vmem:[%s4523_s3 + $0x80] sm:$0xff] }
 0x1a2   : > { %v3348_v37 = vpop.f32.mrf.mxu1  ;;  %1503 = vmatpush.msra.mxu3 %v917_v12  ;;  %v932_v20 = vmax.f32 %v856_v43, 0.0  ;;  %v3526_v61 = vld [vmem:[%s4523_s3 + $0xb0] sm:$0xff]  ;;  %v3531_v49 = vld [vmem:[%s4523_s3 + $0xa0] sm:$0xff]  ;;  %v1026_v43 = vld [vmem:[%s4523_s3 + $0x2b8] sm:$0xff] }
 0x1a3   : > { %1878 = vmatpush.msrb.mxu2 %v918_v40  ;;  %v496_v28 = vpop.permute.xlu1 %495  ;;  %v931_v31 = vmax.f32 %v731_v21, 0.0  ;;  %v3606_v62 = vld [vmem:[%s4523_s3 + $0x110] sm:$0xff] }
 0x1a4   : > { %1504 = vmatpush.msra.mxu3 %v915_v55  ;;  %v734_v34 = vadd.f32 %v3346_v17, %v496_v28  ;;  %v859_v35 = vadd.f32 %v3348_v37, %v496_v28  ;;  %v3406_v37 = vld [vmem:[%s4523_s3 + $0x20] sm:$0xff]  ;;  %v3411_v55 = vld [vmem:[%s4523_s3 + $0x10] sm:$0xff]  ;;  %v1020_v28 = vld [vmem:[%s4523_s3 + $0x288] sm:$0xff] }
 0x1a5   : > { %1879 = vmatpush.msrb.mxu2 %v916_v16 }
 0x1a6   : > { %1802 = vmatmul.f32.gmra.mxu1 %v978_v56  ;;  %1505 = vmatpush.msra.mxu3 %v913_v47  ;;  %v933_v12 = vmax.f32 %v734_v34, 0.0  ;;  %v934_v40 = vmax.f32 %v859_v35, 0.0  ;;  %v3431_v47 = vld [vmem:[%s4523_s3 + $0x28] sm:$0xff]  ;;  %v3611_v35 = vld [vmem:[%s4523_s3 + $0x100] sm:$0xff] }
 0x1a7   : > { %1880 = vmatpush.msrb.mxu2 %v914_v11 }
 0x1a8   : > { %1433 = vmatmul.f32.gmra.mxu2 %v3361_v3  ;;  %1506 = vmatpush.msra.mxu3 %v911_v53  ;;  %v3446_v53 = vld [vmem:[%s4523_s3 + $0x50] sm:$0xff] }
 0x1a9   : > { %1881 = vmatpush.msrb.mxu2 %v912_v7  ;;  %v3451_v7 = vld [vmem:[%s4523_s3 + $0x40] sm:$0xff] }
 0x1aa   : > { %v736_v5 = vpop.f32.mrf.mxu0  ;;  %v861_v56 = vpop.f32.mrf.mxu1  ;;  %1507 = vmatpush.msra.mxu3 %v909_v60  ;;  %v3466_v60 = vld [vmem:[%s4523_s3 + $0x68] sm:$0xff] }
 0x1ab   : > { %1882 = vmatpush.msrb.mxu2 %v910_v59  ;;  %v737_v19 = vadd.f32 %v736_v5, %v501_v63  ;;  %v862_v14 = vadd.f32 %v861_v56, %v501_v63  ;;  %v3471_v59 = vld [vmem:[%s4523_s3 + $0x58] sm:$0xff]  ;;  %v3491_v56 = vld [vmem:[%s4523_s3 + $0x70] sm:$0xff] }
 0x1ac   : > { %1508 = vmatpush.msra.mxu3 %v907_v1  ;;  %v3551_v63 = vld [vmem:[%s4523_s3 + $0xb8] sm:$0xff] }
 0x1ad   : > { %1883 = vmatpush.msrb.mxu2 %v908_v9  ;;  %v935_v33 = vmax.f32 %v737_v19, 0.0  ;;  %v936_v6 = vmax.f32 %v862_v14, 0.0  ;;  %v3571_v19 = vld [vmem:[%s4523_s3 + $0xd0] sm:$0xff]  ;;  %v3586_v14 = vld [vmem:[%s4523_s3 + $0xf8] sm:$0xff] }
 0x1ae   : > { %1805 = vmatmul.f32.gmra.mxu1 %v3335_v36  ;;  %1509 = vmatpush.msra.mxu3 %v905_v32  ;;  %v990_v36 = vld [vmem:[%s4523_s3 + $0x198] sm:$0xff] }
 0x1af   : > { %1884 = vmatpush.msrb.mxu2 %v906_v29  ;;  %v1011_v29 = vld [vmem:[%s4523_s3 + $0x240] sm:$0xff] }
 0x1b0   : > { %1436 = vmatmul.f32.gmra.mxu2 %v987_v10  ;;  %1510 = vmatpush.msra.mxu3 %v903_v45 }
 0x1b1   : > { %1885 = vmatpush.msrb.mxu2 %v904_v54 }
 0x1b2   : > { %v739_v27 = vpop.f32.mrf.mxu0  ;;  %1511 = vmatpush.msra.mxu3 %v901_v18  ;;  %v1014_v18 = vld [vmem:[%s4523_s3 + $0x258] sm:$0xff] }
 0x1b3   : > { %v864_v42 = vpop.f32.mrf.mxu1  ;;  %1886 = vmatpush.msrb.mxu2 %v902_v51  ;;  %v740_v13 = vadd.f32 %v739_v27, %v506_v48  ;;  %v3546_v51 = vld [vmem:[%s4523_s3 + $0xc8] sm:$0xff] }
 0x1b4   : > { %v865_v22 = vadd.f32 %v864_v42, %v506_v48  ;;  %1512 = vmatpush.msra.mxu3 %v899_v26  ;;  %v1008_v48 = vld [vmem:[%s4523_s3 + $0x228] sm:$0xff]  ;;  %v1017_v26 = vld [vmem:[%s4523_s3 + $0x270] sm:$0xff] }
 0x1b5   : > { %1887 = vmatpush.msrb.mxu2 %v900_v0  ;;  %v937_v44 = vmax.f32 %v740_v13, 0.0  ;;  %1513 = vmatmul.f32.vlgmr.msra.gmra.mxu3 %v3385_v57  ;;  %v3566_v0 = vld [vmem:[%s4523_s3 + $0xe0] sm:$0xff] }
 0x1b6   : > { %v938_v15 = vmax.f32 %v865_v22, 0.0  ;;  %1808 = vmatmul.f32.gmra.mxu1 %v3361_v3  ;;  %v3426_v3 = vld [vmem:[%s4523_s3 + $0x38] sm:$0xff] }
 0x1b7   : > { %1634 = vmatpush.msra.mxu0 %v937_v44 }
 0x1b8   : > { %1439 = vmatmul.f32.gmra.mxu2 %v990_v36  ;;  %2009 = vmatpush.msra.mxu1 %v938_v15 }
 0x1b9   : > { %2462 = vmatpush.msrb.mxu3 %v938_v15  ;;  %1635 = vmatpush.msra.mxu0 %v935_v33  ;;  %v1023_v15 = vld [vmem:[%s4523_s3 + $0x2a0] sm:$0xff] }
 0x1ba   : > { %2010 = vmatpush.msra.mxu1 %v936_v6 }
 0x1bb   : > { %v3396_v17 = vpop.f32.mrf.mxu2  ;;  %2463 = vmatpush.msrb.mxu3 %v936_v6  ;;  %v3398_v46 = vpop.f32.mrf.mxu1  ;;  %1636 = vmatpush.msra.mxu0 %v933_v12  ;;  %v3626_v6 = vld [vmem:[%s4523_s3 + $0x128] sm:$0xff]  ;;  %v3631_v12 = vld [vmem:[%s4523_s3 + $0x118] sm:$0xff] }
 0x1bc   : > { %2011 = vmatpush.msra.mxu1 %v934_v40  ;;  %4589 = vst [vmem:[#allocation16_spill] sm:$0xff] %v3631_v12 }
 0x1bd   : > { %2464 = vmatpush.msrb.mxu3 %v934_v40  ;;  %1637 = vmatpush.msra.mxu0 %v931_v31 }
 0x1be   : > { %1811 = vmatmul.f32.gmra.mxu1 %v987_v10  ;;  %1516 = vmatmul.f32.gmra.mxu3 %v3406_v37 }
 0x1bf   : > { %2012 = vmatpush.msra.mxu1 %v932_v20  ;;  %2465 = vmatpush.msrb.mxu3 %v932_v20  ;;  %v1029_v20 = vld [vmem:[%s4523_s3 + $0x2d0] sm:$0xff] }
 0x1c0   : > { %1442 = vmatmul.f32.gmra.mxu2 %v993_v23  ;;  %2370 = vmatmul.msk.f32.vlgmr.msra.gmra.mxu0 %vm1263_vm1, %v3411_v55 }
 0x1c3   : > { %v3416_v16 = vpop.f32.mrf.mxu2  ;;  %v3418_v38 = vpop.f32.mrf.mxu1 }
 0x1c4   : > { %4578 = vst [vmem:[#allocation5_spill] sm:$0xff] %v3418_v38  ;;  %v1044_v38 = vld [vmem:[%s4523_s3 + $0x348] sm:$0xff] }
 0x1c6   : > { %1814 = vmatmul.f32.gmra.mxu1 %v990_v36  ;;  %1519 = vmatmul.f32.gmra.mxu3 %v3426_v3  ;;  %v3591_v36 = vld [vmem:[%s4523_s3 + $0xe8] sm:$0xff] }
 0x1c8   : > { %1445 = vmatmul.f32.gmra.mxu2 %v996_v41  ;;  %2371 = vmatmul.msk.f32.gmra.mxu0 %vm1263_vm1, %v3431_v47 }
 0x1cb   : > { %v3436_v11 = vpop.f32.mrf.mxu2  ;;  %v3438_v39 = vpop.f32.mrf.mxu1 }
 0x1cc   : > { %4579 = vst [vmem:[#allocation6_spill] sm:$0xff] %v3438_v39 }
 0x1ce   : > { %1817 = vmatmul.f32.gmra.mxu1 %v993_v23  ;;  %1522 = vmatmul.f32.gmra.mxu3 %v3446_v53  ;;  %v3646_v23 = vld [vmem:[%s4523_s3 + $0x140] sm:$0xff] }
 0x1d0   : > { %1448 = vmatmul.f32.gmra.mxu2 %v999_v30  ;;  %2372 = vmatmul.msk.f32.gmra.mxu0 %vm1263_vm1, %v3451_v7 }
 0x1d3   : > { %v3456_v24 = vpop.f32.mrf.mxu2  ;;  %v3458_v50 = vpop.f32.mrf.mxu1 }
 0x1d4   : > { %4580 = vst [vmem:[#allocation7_spill] sm:$0xff] %v3458_v50  ;;  %v3737_v50 = vld [vmem:[%s4523_s3 + $0x190] sm:$0xff] }
 0x1d5   : > { %4599 = vst [vmem:[#allocation26_spill] sm:$0xff] %v3737_v50 }
 0x1d6   : > { %1820 = vmatmul.f32.gmra.mxu1 %v996_v41  ;;  %1525 = vmatmul.f32.gmra.mxu3 %v3466_v60  ;;  %v3651_v41 = vld [vmem:[%s4523_s3 + $0x130] sm:$0xff] }
 0x1d7   : > { %4591 = vst [vmem:[#allocation18_spill] sm:$0xff] %v3651_v41 }
 0x1d8   : > { %1451 = vmatmul.f32.gmra.mxu2 %v1002_v52  ;;  %2373 = vmatmul.msk.f32.gmra.mxu0 %vm1263_vm1, %v3471_v59 }
 0x1db   : > { %v3476_v5 = vpop.f32.mrf.mxu2  ;;  %v3478_v4 = vpop.f32.mrf.mxu1 }
 0x1dc   : > { %4581 = vst [vmem:[#allocation8_spill] sm:$0xff] %v3478_v4  ;;  %v3732_v4 = vld [vmem:[%s4523_s3 + $0x1a0] sm:$0xff] }
 0x1de   : > { %1823 = vmatmul.f32.gmra.mxu1 %v999_v30  ;;  %1528 = vmatmul.f32.gmra.mxu3 %v3486_v58 }
 0x1e0   : > { %1454 = vmatmul.f32.gmra.mxu2 %v1005_v8  ;;  %2374 = vmatmul.msk.f32.gmra.mxu0 %vm1263_vm1, %v3491_v56 }
 0x1e3   : > { %v3496_v1 = vpop.f32.mrf.mxu2  ;;  %v3498_v9 = vpop.f32.mrf.mxu1 }
 0x1e4   : > { %4582 = vst [vmem:[#allocation9_spill] sm:$0xff] %v3498_v9  ;;  %v1041_v9 = vld [vmem:[%s4523_s3 + $0x330] sm:$0xff] }
 0x1e6   : > { %1826 = vmatmul.f32.gmra.mxu1 %v1002_v52  ;;  %1531 = vmatmul.f32.gmra.mxu3 %v3506_v2 }
 0x1e8   : > { %1457 = vmatmul.f32.gmra.mxu2 %v1008_v48  ;;  %2375 = vmatmul.msk.f32.gmra.mxu0 %vm1263_vm1, %v3511_v25 }
 0x1eb   : > { %v3516_v10 = vpop.f32.mrf.mxu2  ;;  %v3518_v32 = vpop.f32.mrf.mxu1 }
 0x1ec   : > { %4583 = vst [vmem:[#allocation10_spill] sm:$0xff] %v3518_v32 }
 0x1ee   : > { %1829 = vmatmul.f32.gmra.mxu1 %v1005_v8  ;;  %1534 = vmatmul.f32.gmra.mxu3 %v3526_v61  ;;  %v1032_v8 = vld [vmem:[%s4523_s3 + $0x2e8] sm:$0xff] }
 0x1f0   : > { %1460 = vmatmul.f32.gmra.mxu2 %v1011_v29  ;;  %2376 = vmatmul.msk.f32.gmra.mxu0 %vm1263_vm1, %v3531_v49 }
 0x1f3   : > { %v3536_v45 = vpop.f32.mrf.mxu2  ;;  %v3538_v54 = vpop.f32.mrf.mxu1 }
 0x1f4   : > { %4584 = vst [vmem:[#allocation11_spill] sm:$0xff] %v3538_v54 }
 0x1f6   : > { %1832 = vmatmul.f32.gmra.mxu1 %v1008_v48  ;;  %1537 = vmatmul.f32.gmra.mxu3 %v3546_v51  ;;  %v3666_v48 = vld [vmem:[%s4523_s3 + $0x158] sm:$0xff] }
 0x1f8   : > { %1463 = vmatmul.f32.gmra.mxu2 %v1014_v18  ;;  %2377 = vmatmul.msk.f32.gmra.mxu0 %vm1263_vm1, %v3551_v63 }
 0x1fb   : > { %v3556_v27 = vpop.f32.mrf.mxu2  ;;  %v3558_v42 = vpop.f32.mrf.mxu1 }
 0x1fc   : > { %4585 = vst [vmem:[#allocation12_spill] sm:$0xff] %v3558_v42 }
 0x1fe   : > { %1835 = vmatmul.f32.gmra.mxu1 %v1011_v29  ;;  %1540 = vmatmul.f32.gmra.mxu3 %v3566_v0  ;;  %v3671_v29 = vld [vmem:[%s4523_s3 + $0x148] sm:$0xff] }
 0x1ff   : > { %4593 = vst [vmem:[#allocation20_spill] sm:$0xff] %v3671_v29 }
 0x200   : > { %1466 = vmatmul.f32.gmra.mxu2 %v1017_v26  ;;  %2378 = vmatmul.msk.f32.gmra.mxu0 %vm1263_vm1, %v3571_v19 }
 0x203   : > { %v3576_v13 = vpop.f32.mrf.mxu2  ;;  %v3578_v22 = vpop.f32.mrf.mxu1 }
 0x204   : > { %4586 = vst [vmem:[#allocation13_spill] sm:$0xff] %v3578_v22  ;;  %v3714_v22 = vpop.permute.xlu0 %1085 }
 0x206   : > { %1838 = vmatmul.f32.gmra.mxu1 %v1014_v18  ;;  %1543 = vmatmul.f32.gmra.mxu3 %v3586_v14 }
 0x208   : > { %1469 = vmatmul.f32.gmra.mxu2 %v1020_v28  ;;  %2379 = vmatmul.msk.f32.gmra.mxu0 %vm1263_vm1, %v3591_v36 }
 0x20b   : > { %v3596_v34 = vpop.f32.mrf.mxu2  ;;  %v3598_v44 = vpop.f32.mrf.mxu1 }
 0x20c   : > { %4587 = vst [vmem:[#allocation14_spill] sm:$0xff] %v3598_v44  ;;  %v3711_v44 = vld [vmem:[%s4523_s3 + $0x178] sm:$0xff] }
 0x20d   : > { %4597 = vst [vmem:[#allocation24_spill] sm:$0xff] %v3711_v44 }
 0x20e   : > { %1841 = vmatmul.f32.gmra.mxu1 %v1017_v26  ;;  %1546 = vmatmul.f32.gmra.mxu3 %v3606_v62 }
 0x210   : > { %1472 = vmatmul.f32.gmra.mxu2 %v1023_v15  ;;  %2380 = vmatmul.msk.f32.gmra.mxu0 %vm1263_vm1, %v3611_v35 }
 0x213   : > { %v3616_v21 = vpop.f32.mrf.mxu2  ;;  %v3618_v33 = vpop.f32.mrf.mxu1 }
 0x214   : > { %4588 = vst [vmem:[#allocation15_spill] sm:$0xff] %v3618_v33  ;;  %v1389_v33 = vpop.f32.mrf.mxu0 }
 0x216   : > { %1844 = vmatmul.f32.gmra.mxu1 %v1020_v28  ;;  %1549 = vmatmul.f32.gmra.mxu3 %v3626_v6  ;;  %v1035_v28 = vld [vmem:[%s4523_s3 + $0x300] sm:$0xff] }
 0x218   : > { %1475 = vmatmul.f32.gmra.mxu2 %v1026_v43  ;;  %2381 = vmatmul.msk.f32.gmra.mxu0 %vm1263_vm1, %v3631_v12  ;;  %v4002_v12 = vld [vmem:[%s4523_s3 + $0x2a8] sm:$0xff] }
 0x219   : > { %4639 = vst [vmem:[#allocation66_spill] sm:$0xff] %v4002_v12 }
 0x21b   : > { %v3636_v40 = vpop.f32.mrf.mxu2  ;;  %v3638_v31 = vpop.f32.mrf.mxu1 }
 0x21c   : > { %4590 = vst [vmem:[#allocation17_spill] sm:$0xff] %v3638_v31  ;;  %v3706_v31 = vld [vmem:[%s4523_s3 + $0x188] sm:$0xff] }
 0x21e   : > { %1847 = vmatmul.f32.gmra.mxu1 %v1023_v15  ;;  %1552 = vmatmul.f32.gmra.mxu3 %v3646_v23  ;;  %v3686_v15 = vld [vmem:[%s4523_s3 + $0x170] sm:$0xff] }
 0x220   : > { %1478 = vmatmul.f32.gmra.mxu2 %v1029_v20  ;;  %2382 = vmatmul.msk.f32.gmra.mxu0 %vm1263_vm1, %v3651_v41 }
 0x223   : > { %v3656_v30 = vpop.f32.mrf.mxu2  ;;  %v3658_v52 = vpop.f32.mrf.mxu1 }
 0x224   : > { %4592 = vst [vmem:[#allocation19_spill] sm:$0xff] %v3658_v52 }
 0x226   : > { %1850 = vmatmul.f32.gmra.mxu1 %v1026_v43  ;;  %1555 = vmatmul.f32.gmra.mxu3 %v3666_v48  ;;  %v3691_v43 = vld [vmem:[%s4523_s3 + $0x160] sm:$0xff] }
 0x227   : > { %4595 = vst [vmem:[#allocation22_spill] sm:$0xff] %v3691_v43 }
 0x228   : > { %1481 = vmatmul.f32.gmra.mxu2 %v1032_v8  ;;  %2383 = vmatmul.msk.f32.gmra.mxu0 %vm1263_vm1, %v3671_v29 }
 0x22b   : > { %v3676_v18 = vpop.f32.mrf.mxu2  ;;  %v3678_v26 = vpop.f32.mrf.mxu1 }
 0x22c   : > { %4594 = vst [vmem:[#allocation21_spill] sm:$0xff] %v3678_v26 }
 0x22e   : > { %1853 = vmatmul.f32.gmra.mxu1 %v1029_v20  ;;  %1558 = vmatmul.f32.gmra.mxu3 %v3686_v15  ;;  %v1038_v20 = vld [vmem:[%s4523_s3 + $0x318] sm:$0xff] }
 0x230   : > { %1484 = vmatmul.f32.gmra.mxu2 %v1035_v28  ;;  %2384 = vmatmul.msk.f32.gmra.mxu0 %vm1263_vm1, %v3691_v43 }
 0x233   : > { %v3696_v26 = vpop.f32.mrf.mxu2  ;;  %v3698_v52 = vpop.f32.mrf.mxu1 }
 0x234   : > { %4596 = vst [vmem:[#allocation23_spill] sm:$0xff] %v3698_v52  ;;  %v1390_v52 = vadd.f32 %v1389_v33, %v3714_v22 }
 0x236   : > { %1856 = vmatmul.f32.gmra.mxu1 %v1032_v8  ;;  %1561 = vmatmul.f32.gmra.mxu3 %v3706_v31 }
 0x238   : > { %1487 = vmatmul.f32.gmra.mxu2 %v1038_v20  ;;  %2385 = vmatmul.msk.f32.gmra.mxu0 %vm1263_vm1, %v3711_v44  ;;  %v1514_v42 = vpop.f32.mrf.mxu3 }
 0x239   : > { %v1515_v54 = vadd.f32 %v1514_v42, %v1390_v52  ;;  %v3740_v42 = vpop.permute.xlu1 %1090 }
 0x23a   : > { %4600 = vst [vmem:[#allocation27_spill] sm:$0xff] %v3740_v42  ;;  %v1393_v52 = vadd.f32 %v3396_v17, %v3740_v42  ;;  %v3764_v17 = vld [vmem:[%s4523_s3 + $0x1a8] sm:$0xff] }
 0x23b   : > { %v3722_v8 = vpop.f32.mrf.mxu2  ;;  %v3724_v32 = vpop.f32.mrf.mxu1  ;;  %4602 = vst [vmem:[#allocation29_spill] sm:$0xff] %v3764_v17 }
 0x23c   : > { %4598 = vst [vmem:[#allocation25_spill] sm:$0xff] %v3724_v32 }
 0x23d   : > { %v1639_v33 = vpop.f32.mrf.mxu0 }
 0x23e   : > { %1859 = vmatmul.f32.gmra.mxu1 %v1035_v28  ;;  %v1640_v39 = vadd.f32 %v1639_v33, %v1515_v54  ;;  %1564 = vmatmul.f32.gmra.mxu3 %v3732_v4 }
 0x240   : > { %1490 = vmatmul.f32.gmra.mxu2 %v1041_v9  ;;  %2122 = vst [vmem:[%s3742_s10] sm:$0xff] %v1640_v39  ;;  %2386 = vmatmul.msk.f32.gmra.mxu0 %vm1263_vm1, %v3737_v50  ;;  %v3759_v39 = vld [vmem:[%s4523_s3 + $0x1b8] sm:$0xff] }
 0x241   : > { %v1517_v32 = vpop.f32.mrf.mxu3 }
 0x242   : > { %v1518_v54 = vadd.f32 %v1517_v32, %v1393_v52  ;;  %v3767_v32 = vpop.permute.xlu2 %1095 }
 0x243   : > { %v3749_v28 = vpop.f32.mrf.mxu2  ;;  %v3751_v33 = vpop.f32.mrf.mxu1  ;;  %4603 = vst [vmem:[#allocation30_spill] sm:$0xff] %v3767_v32  ;;  %v1396_v52 = vadd.f32 %v3416_v16, %v3767_v32 }
 0x244   : > { %4601 = vst [vmem:[#allocation28_spill] sm:$0xff] %v3751_v33  ;;  %v3790_v16 = vpop.permute.xlu0 %1100 }
 0x245   : > { %v1642_v44 = vpop.f32.mrf.mxu0  ;;  %4606 = vst [vmem:[#allocation33_spill] sm:$0xff] %v3790_v16 }
 0x246   : > { %1862 = vmatmul.f32.gmra.mxu1 %v1038_v20  ;;  %v1643_v42 = vadd.f32 %v1642_v44, %v1518_v54  ;;  %1567 = vmatmul.f32.gmra.mxu3 %v3759_v39  ;;  %v3781_v44 = vld [vmem:[%s4523_s3 + $0x1d0] sm:$0xff] }
 0x248   : > { %1493 = vmatmul.f32.gmra.mxu2 %v1044_v38  ;;  %2124 = vst [vmem:[%s3742_s10 + $0x10] sm:$0xff] %v1643_v42  ;;  %2387 = vmatmul.msk.f32.gmra.mxu0 %vm1263_vm1, %v3764_v17  ;;  %v3786_v42 = vld [vmem:[%s4523_s3 + $0x1c0] sm:$0xff] }
 0x249   : > { %v1520_v33 = vpop.f32.mrf.mxu3  ;;  %4605 = vst [vmem:[#allocation32_spill] sm:$0xff] %v3786_v42 }
 0x24a   : > { %v1521_v50 = vadd.f32 %v1520_v33, %v1396_v52 }
 0x24b   : > { %v3774_v20 = vpop.f32.mrf.mxu2  ;;  %v3776_v43 = vpop.f32.mrf.mxu1 }
 0x24c   : > { %4604 = vst [vmem:[#allocation31_spill] sm:$0xff] %v3776_v43 }
 0x24d   : > { %v1645_v54 = vpop.f32.mrf.mxu0 }
 0x24e   : > { %1865 = vmatmul.f32.gmra.mxu1 %v1041_v9  ;;  %v1646_v17 = vadd.f32 %v1645_v54, %v1521_v50  ;;  %1570 = vmatmul.f32.gmra.mxu3 %v3781_v44  ;;  %v1399_v9 = vadd.f32 %v3436_v11, %v3790_v16  ;;  %v3813_v11 = vpop.permute.xlu1 %1105 }
 0x24f   : > { %4609 = vst [vmem:[#allocation36_spill] sm:$0xff] %v3813_v11 }
 0x250   : > { %1888 = vmatmul.f32.vlgmr.msrb.gmra.mxu2 %v3385_v57  ;;  %2126 = vst [vmem:[%s3742_s10 + $0x20] sm:$0xff] %v1646_v17  ;;  %2388 = vmatmul.msk.f32.gmra.mxu0 %vm1263_vm1, %v3786_v42  ;;  %v3804_v57 = vld [vmem:[%s4523_s3 + $0x1e8] sm:$0xff]  ;;  %v3809_v17 = vld [vmem:[%s4523_s3 + $0x1d8] sm:$0xff] }
 0x251   : > { %v1523_v52 = vpop.f32.mrf.mxu3  ;;  %4608 = vst [vmem:[#allocation35_spill] sm:$0xff] %v3809_v17 }
 0x252   : > { %v1524_v43 = vadd.f32 %v1523_v52, %v1399_v9 }
 0x253   : > { %v3797_v33 = vpop.f32.mrf.mxu2  ;;  %v3799_v32 = vpop.f32.mrf.mxu1 }
 0x254   : > { %4607 = vst [vmem:[#allocation34_spill] sm:$0xff] %v3799_v32 }
 0x255   : > { %v1648_v50 = vpop.f32.mrf.mxu0 }
 0x256   : > { %1868 = vmatmul.f32.gmra.mxu1 %v1044_v38  ;;  %v1649_v54 = vadd.f32 %v1648_v50, %v1524_v43  ;;  %1573 = vmatmul.f32.gmra.mxu3 %v3804_v57  ;;  %v1402_v38 = vadd.f32 %v3456_v24, %v3813_v11  ;;  %v3834_v50 = vld [vmem:[%s4523_s3 + $0x1f0] sm:$0xff] }
 0x257   : > { %4611 = vst [vmem:[#allocation38_spill] sm:$0xff] %v3834_v50 }
 0x258   : > { %1891 = vmatmul.f32.gmra.mxu2 %v3406_v37  ;;  %2128 = vst [vmem:[%s3742_s10 + $0x30] sm:$0xff] %v1649_v54  ;;  %2389 = vmatmul.msk.f32.gmra.mxu0 %vm1263_vm1, %v3809_v17  ;;  %v3827_v37 = vld [vmem:[%s4523_s3 + $0x200] sm:$0xff]  ;;  %v3838_v54 = vpop.permute.xlu2 %1110 }
 0x259   : > { %v1526_v52 = vpop.f32.mrf.mxu3  ;;  %4612 = vst [vmem:[#allocation39_spill] sm:$0xff] %v3838_v54 }
 0x25a   : > { %v1527_v32 = vadd.f32 %v1526_v52, %v1402_v38 }
 0x25b   : > { %v3820_v9 = vpop.f32.mrf.mxu2  ;;  %v3822_v16 = vpop.f32.mrf.mxu1 }
 0x25c   : > { %4610 = vst [vmem:[#allocation37_spill] sm:$0xff] %v3822_v16 }
 0x25d   : > { %v1651_v43 = vpop.f32.mrf.mxu0 }
 0x25e   : > { %2406 = vmatmul.msk.f32.vlgmr.msra.gmra.mxu1 %vm1263_vm1, %v3411_v55  ;;  %v1652_v24 = vadd.f32 %v1651_v43, %v1527_v32  ;;  %1576 = vmatmul.f32.gmra.mxu3 %v3827_v37  ;;  %v1405_v55 = vadd.f32 %v3476_v5, %v3838_v54  ;;  %v3857_v43 = vld [vmem:[%s4523_s3 + $0x208] sm:$0xff] }
 0x25f   : > { %4614 = vst [vmem:[#allocation41_spill] sm:$0xff] %v3857_v43 }
 0x260   : > { %1894 = vmatmul.f32.gmra.mxu2 %v3426_v3  ;;  %2130 = vst [vmem:[%s3742_s10 + $0x40] sm:$0xff] %v1652_v24  ;;  %2390 = vmatmul.msk.f32.gmra.mxu0 %vm1263_vm1, %v3834_v50  ;;  %v3852_v3 = vld [vmem:[%s4523_s3 + $0x218] sm:$0xff]  ;;  %v3859_v50 = vpop.permute.xlu0 %1115 }
 0x261   : > { %v1529_v52 = vpop.f32.mrf.mxu3  ;;  %4615 = vst [vmem:[#allocation42_spill] sm:$0xff] %v3859_v50  ;;  %v1408_v5 = vadd.f32 %v3496_v1, %v3859_v50 }
 0x262   : > { %v1530_v16 = vadd.f32 %v1529_v52, %v1405_v55 }
 0x263   : > { %v3845_v38 = vpop.f32.mrf.mxu2  ;;  %v3847_v11 = vpop.f32.mrf.mxu1 }
 0x264   : > { %4613 = vst [vmem:[#allocation40_spill] sm:$0xff] %v3847_v11 }
 0x265   : > { %v1654_v32 = vpop.f32.mrf.mxu0 }
 0x266   : > { %v1655_v24 = vadd.f32 %v1654_v32, %v1530_v16  ;;  %1579 = vmatmul.f32.gmra.mxu3 %v3852_v3  ;;  %v3875_v16 = vld [vmem:[%s4523_s3 + $0x230] sm:$0xff] }
 0x268   : > { %1897 = vmatmul.f32.gmra.mxu2 %v3446_v53  ;;  %2132 = vst [vmem:[%s3742_s10 + $0x50] sm:$0xff] %v1655_v24  ;;  %2391 = vmatmul.msk.f32.gmra.mxu0 %vm1263_vm1, %v3857_v43  ;;  %v3880_v53 = vld [vmem:[%s4523_s3 + $0x220] sm:$0xff]  ;;  %v3882_v43 = vpop.permute.xlu1 %1120  ;;  %v3889_v1 = vpop.permute.xlu0 %1130 }
 0x269   : > { %v1532_v52 = vpop.f32.mrf.mxu3  ;;  %4617 = vst [vmem:[#allocation44_spill] sm:$0xff] %v3880_v53 }
 0x26a   : > { %v1533_v11 = vadd.f32 %v1532_v52, %v1408_v5  ;;  %4618 = vst [vmem:[#allocation45_spill] sm:$0xff] %v3882_v43  ;;  %v1411_v5 = vadd.f32 %v3516_v10, %v3882_v43  ;;  %v3909_v10 = vpop.permute.xlu2 %1125 }
 0x26b   : > { %v3868_v55 = vpop.f32.mrf.mxu2  ;;  %v3870_v54 = vpop.f32.mrf.mxu1  ;;  %4619 = vst [vmem:[#allocation46_spill] sm:$0xff] %v3889_v1 }
 0x26c   : > { %4616 = vst [vmem:[#allocation43_spill] sm:$0xff] %v3870_v54 }
 0x26d   : > { %v1657_v32 = vpop.f32.mrf.mxu0  ;;  %4622 = vst [vmem:[#allocation49_spill] sm:$0xff] %v3909_v10 }
 0x26e   : > { %v1658_v24 = vadd.f32 %v1657_v32, %v1533_v11  ;;  %1582 = vmatmul.f32.gmra.mxu3 %v3875_v16 }
 0x270   : > { %1900 = vmatmul.f32.gmra.mxu2 %v3466_v60  ;;  %2134 = vst [vmem:[%s3742_s10 + $0x60] sm:$0xff] %v1658_v24  ;;  %2392 = vmatmul.msk.f32.gmra.mxu0 %vm1263_vm1, %v3880_v53  ;;  %v3900_v60 = vld [vmem:[%s4523_s3 + $0x248] sm:$0xff]  ;;  %v3905_v53 = vld [vmem:[%s4523_s3 + $0x238] sm:$0xff] }
 0x271   : > { %v1535_v54 = vpop.f32.mrf.mxu3  ;;  %4621 = vst [vmem:[#allocation48_spill] sm:$0xff] %v3905_v53 }
 0x272   : > { %v1536_v11 = vadd.f32 %v1535_v54, %v1411_v5  ;;  %v3914_v54 = vpop.permute.xlu1 %1135  ;;  %v1414_v5 = vadd.f32 %v3536_v45, %v3909_v10  ;;  %v3943_v10 = vpop.permute.xlu2 %1140 }
 0x273   : > { %v3893_v52 = vpop.f32.mrf.mxu2  ;;  %v3895_v32 = vpop.f32.mrf.mxu1  ;;  %4623 = vst [vmem:[#allocation50_spill] sm:$0xff] %v3914_v54 }
 0x274   : > { %4620 = vst [vmem:[#allocation47_spill] sm:$0xff] %v3895_v32 }
 0x275   : > { %v1660_v24 = vpop.f32.mrf.mxu0  ;;  %4627 = vst [vmem:[#allocation54_spill] sm:$0xff] %v3943_v10 }
 0x276   : > { %v1661_v50 = vadd.f32 %v1660_v24, %v1536_v11  ;;  %1585 = vmatmul.f32.gmra.mxu3 %v3900_v60  ;;  %v3920_v11 = vpop.permute.xlu0 %1145 }
 0x277   : > { %4624 = vst [vmem:[#allocation51_spill] sm:$0xff] %v3920_v11 }
 0x278   : > { %1903 = vmatmul.f32.gmra.mxu2 %v3486_v58  ;;  %2136 = vst [vmem:[%s3742_s10 + $0x70] sm:$0xff] %v1661_v50  ;;  %2393 = vmatmul.msk.f32.gmra.mxu0 %vm1263_vm1, %v3905_v53  ;;  %v3927_v58 = vld [vmem:[%s4523_s3 + $0x260] sm:$0xff]  ;;  %v3932_v53 = vld [vmem:[%s4523_s3 + $0x250] sm:$0xff] }
 0x279   : > { %v1538_v43 = vpop.f32.mrf.mxu3  ;;  %4626 = vst [vmem:[#allocation53_spill] sm:$0xff] %v3932_v53 }
 0x27a   : > { %v1539_v24 = vadd.f32 %v1538_v43, %v1414_v5  ;;  %v1417_v43 = vadd.f32 %v3556_v27, %v3889_v1  ;;  %v3959_v27 = vld [vmem:[%s4523_s3 + $0x268] sm:$0xff] }
 0x27b   : > { %v3918_v32 = vpop.f32.mrf.mxu2  ;;  %v3922_v17 = vpop.f32.mrf.mxu1  ;;  %4631 = vst [vmem:[#allocation58_spill] sm:$0xff] %v3959_v27 }
 0x27c   : > { %4625 = vst [vmem:[#allocation52_spill] sm:$0xff] %v3922_v17 }
 0x27d   : > { %v1663_v50 = vpop.f32.mrf.mxu0 }
 0x27e   : > { %v1664_v45 = vadd.f32 %v1663_v50, %v1539_v24  ;;  %1588 = vmatmul.f32.gmra.mxu3 %v3927_v58  ;;  %v3947_v24 = vpop.permute.xlu1 %1150  ;;  %v3954_v50 = vpop.permute.xlu0 %1160 }
 0x27f   : > { %4629 = vst [vmem:[#allocation56_spill] sm:$0xff] %v3947_v24 }
 0x280   : > { %1906 = vmatmul.f32.gmra.mxu2 %v3506_v2  ;;  %2138 = vst [vmem:[%s3742_s10 + $0x80] sm:$0xff] %v1664_v45  ;;  %2394 = vmatmul.msk.f32.gmra.mxu0 %vm1263_vm1, %v3932_v53  ;;  %v3952_v2 = vld [vmem:[%s4523_s3 + $0x278] sm:$0xff] }
 0x281   : > { %v1541_v17 = vpop.f32.mrf.mxu3  ;;  %4630 = vst [vmem:[#allocation57_spill] sm:$0xff] %v3954_v50 }
 0x282   : > { %v1542_v42 = vadd.f32 %v1541_v17, %v1417_v43  ;;  %v1420_v17 = vadd.f32 %v3576_v13, %v3914_v54 }
 0x283   : > { %v3941_v5 = vpop.f32.mrf.mxu2  ;;  %v3945_v29 = vpop.f32.mrf.mxu1 }
 0x284   : > { %4628 = vst [vmem:[#allocation55_spill] sm:$0xff] %v3945_v29 }
 0x285   : > { %v1666_v45 = vpop.f32.mrf.mxu0 }
 0x286   : > { %v1667_v1 = vadd.f32 %v1666_v45, %v1542_v42  ;;  %1591 = vmatmul.f32.gmra.mxu3 %v3952_v2  ;;  %v3975_v42 = vld [vmem:[%s4523_s3 + $0x290] sm:$0xff]  ;;  %v3982_v45 = vld [vmem:[%s4523_s3 + $0x280] sm:$0xff]  ;;  %v3984_v54 = vpop.permute.xlu1 %1165 }
 0x287   : > { %4633 = vst [vmem:[#allocation60_spill] sm:$0xff] %v3975_v42 }
 0x288   : > { %1909 = vmatmul.f32.gmra.mxu2 %v3526_v61  ;;  %2140 = vst [vmem:[%s3742_s10 + $0x90] sm:$0xff] %v1667_v1  ;;  %2395 = vmatmul.msk.f32.gmra.mxu0 %vm1263_vm1, %v3959_v27  ;;  %v3977_v61 = vpop.permute.xlu2 %1155  ;;  %v3986_v27 = vpop.permute.xlu0 %1175 }
 0x289   : > { %v1544_v29 = vpop.f32.mrf.mxu3  ;;  %4634 = vst [vmem:[#allocation61_spill] sm:$0xff] %v3977_v61 }
 0x28a   : > { %v1545_v53 = vadd.f32 %v1544_v29, %v1420_v17  ;;  %4635 = vst [vmem:[#allocation62_spill] sm:$0xff] %v3982_v45  ;;  %v1423_v29 = vadd.f32 %v3596_v34, %v3943_v10 }
 0x28b   : > { %v3968_v43 = vpop.f32.mrf.mxu2  ;;  %v3970_v41 = vpop.f32.mrf.mxu1  ;;  %4636 = vst [vmem:[#allocation63_spill] sm:$0xff] %v3984_v54 }
 0x28c   : > { %4632 = vst [vmem:[#allocation59_spill] sm:$0xff] %v3970_v41 }
 0x28d   : > { %v1669_v1 = vpop.f32.mrf.mxu0  ;;  %4637 = vst [vmem:[#allocation64_spill] sm:$0xff] %v3986_v27 }
 0x28e   : > { %v1670_v13 = vadd.f32 %v1669_v1, %v1545_v53  ;;  %1594 = vmatmul.f32.gmra.mxu3 %v3975_v42  ;;  %v4016_v34 = vpop.permute.xlu1 %1180 }
 0x28f   : > { %4642 = vst [vmem:[#allocation69_spill] sm:$0xff] %v4016_v34 }
 0x290   : > { %1912 = vmatmul.f32.gmra.mxu2 %v3546_v51  ;;  %2142 = vst [vmem:[%s3742_s10 + $0xa0] sm:$0xff] %v1670_v13  ;;  %2396 = vmatmul.msk.f32.gmra.mxu0 %vm1263_vm1, %v3982_v45  ;;  %v4007_v51 = vld [vmem:[%s4523_s3 + $0x298] sm:$0xff]  ;;  %v4009_v45 = vpop.permute.xlu2 %1170 }
 0x291   : > { %v1547_v41 = vpop.f32.mrf.mxu3  ;;  %4640 = vst [vmem:[#allocation67_spill] sm:$0xff] %v4007_v51 }
 0x292   : > { %v1548_v53 = vadd.f32 %v1547_v41, %v1423_v29  ;;  %4641 = vst [vmem:[#allocation68_spill] sm:$0xff] %v4009_v45  ;;  %v4018_v41 = vpop.permute.xlu0 %1190  ;;  %v1426_v29 = vadd.f32 %v3616_v21, %v3920_v11 }
 0x293   : > { %v3995_v17 = vpop.f32.mrf.mxu2  ;;  %v3997_v1 = vpop.f32.mrf.mxu1 }
 0x294   : > { %4638 = vst [vmem:[#allocation65_spill] sm:$0xff] %v3997_v1 }
 0x295   : > { %v1672_v42 = vpop.f32.mrf.mxu0 }
 0x296   : > { %v1673_v13 = vadd.f32 %v1672_v42, %v1548_v53  ;;  %1597 = vmatmul.f32.gmra.mxu3 %v4002_v12  ;;  %v4047_v11 = vpop.permute.xlu1 %1195 }
 0x298   : > { %1915 = vmatmul.f32.gmra.mxu2 %v3566_v0  ;;  %2144 = vst [vmem:[%s3742_s10 + $0xb0] sm:$0xff] %v1673_v13  ;;  %2397 = vmatmul.msk.f32.gmra.mxu0 %vm1263_vm1, %v4007_v51  ;;  %v4029_v0 = vld [vmem:[%s4523_s3 + $0x2c0] sm:$0xff]  ;;  %v4034_v51 = vld [vmem:[%s4523_s3 + $0x2b0] sm:$0xff]  ;;  %v4041_v21 = vpop.permute.xlu2 %1185 }
 0x299   : > { %v1550_v42 = vpop.f32.mrf.mxu3  ;;  %4645 = vst [vmem:[#allocation72_spill] sm:$0xff] %v4029_v0 }
 0x29a   : > { %v1551_v53 = vadd.f32 %v1550_v42, %v1426_v29  ;;  %4646 = vst [vmem:[#allocation73_spill] sm:$0xff] %v4034_v51  ;;  %v1429_v29 = vadd.f32 %v3636_v40, %v3947_v24  ;;  %v4061_v40 = vld [vmem:[%s4523_s3 + $0x2c8] sm:$0xff] }
 0x29b   : > { %v4022_v1 = vpop.f32.mrf.mxu2  ;;  %v4024_v10 = vpop.f32.mrf.mxu1  ;;  %4650 = vst [vmem:[#allocation77_spill] sm:$0xff] %v4061_v40 }
 0x29c   : > { %4643 = vst [vmem:[#allocation70_spill] sm:$0xff] %v4022_v1 }
 0x29d   : > { %4644 = vst [vmem:[#allocation71_spill] sm:$0xff] %v4024_v10  ;;  %v1675_v13 = vpop.f32.mrf.mxu0 }
 0x29e   : > { %v1676_v12 = vadd.f32 %v1675_v13, %v1551_v53  ;;  %1600 = vmatmul.f32.gmra.mxu3 %v4029_v0  ;;  %v4051_v0 = vpop.permute.xlu0 %1205 }
 0x2a0   : > { %1918 = vmatmul.f32.gmra.mxu2 %v3586_v14  ;;  %2146 = vst [vmem:[%s3742_s10 + $0xc0] sm:$0xff] %v1676_v12  ;;  %2398 = vmatmul.msk.f32.gmra.mxu0 %vm1263_vm1, %v4034_v51  ;;  %v4056_v14 = vld [vmem:[%s4523_s3 + $0x2d8] sm:$0xff]  ;;  %v4072_v51 = vpop.permute.xlu2 %1200 }
 0x2a1   : > { %v1553_v10 = vpop.f32.mrf.mxu3  ;;  %4649 = vst [vmem:[#allocation76_spill] sm:$0xff] %v4056_v14 }
 0x2a2   : > { %v1554_v53 = vadd.f32 %v1553_v10, %v1429_v29  ;;  %v1432_v10 = vadd.f32 %v3656_v30, %v3977_v61  ;;  %v4086_v30 = vld [vmem:[%s4523_s3 + $0x2e0] sm:$0xff] }
 0x2a3   : > { %v4045_v42 = vpop.f32.mrf.mxu2  ;;  %v4049_v13 = vpop.f32.mrf.mxu1  ;;  %4653 = vst [vmem:[#allocation80_spill] sm:$0xff] %v4086_v30 }
 0x2a4   : > { %4647 = vst [vmem:[#allocation74_spill] sm:$0xff] %v4045_v42 }
 0x2a5   : > { %4648 = vst [vmem:[#allocation75_spill] sm:$0xff] %v4049_v13  ;;  %v1678_v12 = vpop.f32.mrf.mxu0 }
 0x2a6   : > { %v1679_v24 = vadd.f32 %v1678_v12, %v1554_v53  ;;  %1603 = vmatmul.f32.gmra.mxu3 %v4056_v14  ;;  %v4088_v12 = vpop.permute.xlu0 %1220 }
 0x2a8   : > { %1921 = vmatmul.f32.gmra.mxu2 %v3606_v62  ;;  %2148 = vst [vmem:[%s3742_s10 + $0xd0] sm:$0xff] %v1679_v24  ;;  %2399 = vmatmul.msk.f32.gmra.mxu0 %vm1263_vm1, %v4061_v40  ;;  %v4079_v62 = vld [vmem:[%s4523_s3 + $0x2f0] sm:$0xff]  ;;  %v4081_v24 = vpop.permute.xlu1 %1210 }
 0x2a9   : > { %v1556_v13 = vpop.f32.mrf.mxu3  ;;  %4652 = vst [vmem:[#allocation79_spill] sm:$0xff] %v4079_v62 }
 0x2aa   : > { %v1557_v42 = vadd.f32 %v1556_v13, %v1432_v10  ;;  %v1435_v13 = vadd.f32 %v3676_v18, %v3954_v50 }
 0x2ab   : > { %v4070_v29 = vpop.f32.mrf.mxu2  ;;  %v4074_v1 = vpop.f32.mrf.mxu1 }
 0x2ac   : > { %4651 = vst [vmem:[#allocation78_spill] sm:$0xff] %v4074_v1 }
 0x2ad   : > { %v1681_v53 = vpop.f32.mrf.mxu0 }
 0x2ae   : > { %v1682_v61 = vadd.f32 %v1681_v53, %v1557_v42  ;;  %1606 = vmatmul.f32.gmra.mxu3 %v4079_v62  ;;  %v4104_v42 = vld [vmem:[%s4523_s3 + $0x308] sm:$0xff]  ;;  %v4111_v53 = vld [vmem:[%s4523_s3 + $0x2f8] sm:$0xff] }
 0x2af   : > { %4655 = vst [vmem:[#allocation82_spill] sm:$0xff] %v4104_v42 }
 0x2b0   : > { %1924 = vmatmul.f32.gmra.mxu2 %v3626_v6  ;;  %2150 = vst [vmem:[%s3742_s10 + $0xe0] sm:$0xff] %v1682_v61  ;;  %2400 = vmatmul.msk.f32.gmra.mxu0 %vm1263_vm1, %v4086_v30  ;;  %v4106_v6 = vpop.permute.xlu2 %1215  ;;  %v4113_v50 = vpop.permute.xlu1 %1225 }
 0x2b1   : > { %v1559_v1 = vpop.f32.mrf.mxu3  ;;  %4656 = vst [vmem:[#allocation83_spill] sm:$0xff] %v4111_v53 }
 0x2b2   : > { %v1560_v40 = vadd.f32 %v1559_v1, %v1435_v13  ;;  %v4117_v1 = vpop.permute.xlu0 %1235  ;;  %v1438_v13 = vadd.f32 %v3696_v26, %v3984_v54 }
 0x2b3   : > { %v4097_v10 = vpop.f32.mrf.mxu2  ;;  %v4099_v14 = vpop.f32.mrf.mxu1 }
 0x2b4   : > { %4654 = vst [vmem:[#allocation81_spill] sm:$0xff] %v4099_v14 }
 0x2b5   : > { %v1684_v61 = vpop.f32.mrf.mxu0 }
 0x2b6   : > { %v1685_v18 = vadd.f32 %v1684_v61, %v1560_v40  ;;  %1609 = vmatmul.f32.gmra.mxu3 %v4104_v42 }
 0x2b8   : > { %1927 = vmatmul.f32.gmra.mxu2 %v3646_v23  ;;  %2152 = vst [vmem:[%s3742_s10 + $0xf0] sm:$0xff] %v1685_v18  ;;  %2401 = vmatmul.msk.f32.gmra.mxu0 %vm1263_vm1, %v4111_v53  ;;  %v4131_v23 = vld [vmem:[%s4523_s3 + $0x320] sm:$0xff]  ;;  %v4136_v18 = vld [vmem:[%s4523_s3 + $0x310] sm:$0xff]  ;;  %v4138_v62 = vpop.permute.xlu2 %1230  ;;  %v4145_v26 = vpop.permute.xlu1 %1240 }
 0x2b9   : > { %v1562_v30 = vpop.f32.mrf.mxu3  ;;  %4658 = vst [vmem:[#allocation85_spill] sm:$0xff] %v4131_v23 }
 0x2ba   : > { %v1563_v40 = vadd.f32 %v1562_v30, %v1438_v13  ;;  %4659 = vst [vmem:[#allocation86_spill] sm:$0xff] %v4136_v18  ;;  %v1441_v30 = vadd.f32 %v3722_v8, %v4009_v45  ;;  %v4149_v13 = vpop.permute.xlu0 %1250  ;;  %v4164_v8 = vld [vmem:[%s4523_s3 + $0x328] sm:$0xff] }
 0x2bb   : > { %v4124_v14 = vpop.f32.mrf.mxu2  ;;  %v4126_v61 = vpop.f32.mrf.mxu1  ;;  %4663 = vst [vmem:[#allocation90_spill] sm:$0xff] %v4164_v8 }
 0x2bc   : > { %4657 = vst [vmem:[#allocation84_spill] sm:$0xff] %v4126_v61 }
 0x2bd   : > { %v1687_v42 = vpop.f32.mrf.mxu0 }
 0x2be   : > { %v1688_v53 = vadd.f32 %v1687_v42, %v1563_v40  ;;  %1612 = vmatmul.f32.gmra.mxu3 %v4131_v23 }
 0x2c0   : > { %1930 = vmatmul.f32.gmra.mxu2 %v3666_v48  ;;  %2154 = vst [vmem:[%s3742_s10 + $0x100] sm:$0xff] %v1688_v53  ;;  %2402 = vmatmul.msk.f32.gmra.mxu0 %vm1263_vm1, %v4136_v18  ;;  %v4159_v48 = vld [vmem:[%s4523_s3 + $0x338] sm:$0xff] }
 0x2c1   : > { %v1565_v61 = vpop.f32.mrf.mxu3  ;;  %4662 = vst [vmem:[#allocation89_spill] sm:$0xff] %v4159_v48 }
 0x2c2   : > { %v1566_v40 = vadd.f32 %v1565_v61, %v1441_v30  ;;  %v1444_v61 = vadd.f32 %v3749_v28, %v3986_v27  ;;  %v4190_v28 = vld [vmem:[%s4523_s3 + $0x340] sm:$0xff] }
 0x2c3   : > { %v4151_v42 = vpop.f32.mrf.mxu2  ;;  %v1863_v54 = vpop.f32.mrf.mxu1 }
 0x2c4   : > { %4660 = vst [vmem:[#allocation87_spill] sm:$0xff] %v4151_v42  ;;  %v4154_v23 = vadd.f32 %v1863_v54, %v4149_v13  ;;  %v4171_v54 = vpop.permute.xlu2 %1245 }
 0x2c5   : > { %v1690_v53 = vpop.f32.mrf.mxu0 }
 0x2c6   : > { %4661 = vst [vmem:[#allocation88_spill] sm:$0xff] %v4154_v23  ;;  %v1691_v45 = vadd.f32 %v1690_v53, %v1566_v40  ;;  %1615 = vmatmul.f32.gmra.mxu3 %v4159_v48  ;;  %v4175_v23 = vpop.permute.xlu1 %1255 }
 0x2c8   : > { %1933 = vmatmul.f32.gmra.mxu2 %v3686_v15  ;;  %2156 = vst [vmem:[%s3742_s10 + $0x110] sm:$0xff] %v1691_v45  ;;  %2403 = vmatmul.msk.f32.gmra.mxu0 %vm1263_vm1, %v4164_v8  ;;  %v4183_v15 = vld [vmem:[%s4523_s3 + $0x350] sm:$0xff] }
 0x2c9   : > { %v1568_v30 = vpop.f32.mrf.mxu3 }
 0x2ca   : > { %v1569_v18 = vadd.f32 %v1568_v30, %v1444_v61 }
 0x2cb   : > { %v1866_v42 = vpop.f32.mrf.mxu1  ;;  %v4185_v45 = vpop.f32.mrf.mxu2 }
 0x2cc   : > { %v4178_v40 = vadd.f32 %v1866_v42, %v4175_v23  ;;  %v1447_v42 = vadd.f32 %v3774_v20, %v4016_v34  ;;  %v4199_v30 = vpop.permute.xlu2 %1260  ;;  %v1765_v20 = vadd.f32 %v3398_v46, %v3714_v22  ;;  %v1453_v46 = vadd.f32 %v3820_v9, %v4018_v41 }
 0x2cd   : > { %v1693_v53 = vpop.f32.mrf.mxu0 }
 0x2ce   : > { %4664 = vst [vmem:[#allocation91_spill] sm:$0xff] %v4178_v40  ;;  %v1694_v27 = vadd.f32 %v1693_v53, %v1569_v18  ;;  %1618 = vmatmul.f32.gmra.mxu3 %v4183_v15 }
 0x2d0   : > { %1936 = vmatmul.f32.gmra.mxu2 %v3706_v31  ;;  %2158 = vst [vmem:[%s3742_s10 + $0x120] sm:$0xff] %v1694_v27  ;;  %2404 = vmatmul.msk.f32.gmra.mxu0 %vm1263_vm1, %v4190_v28  ;;  %v4207_v31 = vld [vmem:[%s4523_s3 + $0x358] sm:$0xff] }
 0x2d1   : > { %v1571_v61 = vpop.f32.mrf.mxu3 }
 0x2d2   : > { %v1572_v40 = vadd.f32 %v1571_v61, %v1447_v42 }
 0x2d3   : > { %v1869_v8 = vpop.f32.mrf.mxu1  ;;  %v1889_v53 = vpop.f32.mrf.mxu2 }
 0x2d4   : > { %v4202_v48 = vadd.f32 %v1869_v8, %v4199_v30  ;;  %v1450_v8 = vadd.f32 %v3797_v33, %v4041_v21  ;;  %v1890_v42 = vadd.f32 %v1889_v53, %v1765_v20 }
 0x2d5   : > { %v1696_v18 = vpop.f32.mrf.mxu0 }
 0x2d6   : > { %4665 = vst [vmem:[#allocation92_spill] sm:$0xff] %v4202_v48  ;;  %v1697_v27 = vadd.f32 %v1696_v18, %v1572_v40  ;;  %2407 = vmatmul.msk.f32.vlgmr.msrb.gmra.mxu3 %vm1263_vm1, %v3431_v47 }
 0x2d8   : > { %1939 = vmatmul.f32.gmra.mxu2 %v3732_v4  ;;  %2160 = vst [vmem:[%s3742_s10 + $0x130] sm:$0xff] %v1697_v27  ;;  %2405 = vmatmul.msk.f32.gmra.mxu0 %vm1263_vm1, %v4207_v31 }
 0x2d9   : > { %v1574_v61 = vpop.f32.mrf.mxu3 }
 0x2da   : > { %v1575_v40 = vadd.f32 %v1574_v61, %v1450_v8 }
 0x2db   : > { %v2014_v18 = vpop.f32.mrf.mxu1 }
 0x2dc   : > { %v2015_v4 = vadd.f32 %v2014_v18, %v1890_v42 }
 0x2dd   : > { %v1699_v48 = vpop.f32.mrf.mxu0 }
 0x2de   : > { %2123 = vst [vmem:[%s3742_s10 + $0x8] sm:$0xff] %v2015_v4  ;;  %v1700_v34 = vadd.f32 %v1699_v48, %v1575_v40  ;;  %2408 = vmatmul.msk.f32.gmra.mxu3 %vm1263_vm1, %v3451_v7 }
 0x2e0   : > { %1942 = vmatmul.f32.gmra.mxu2 %v3759_v39  ;;  %2162 = vst [vmem:[%s3742_s10 + $0x140] sm:$0xff] %v1700_v34  ;;  %v1456_v39 = vadd.f32 %v3845_v38, %v4047_v11 }
 0x2e1   : > { %v1577_v47 = vpop.f32.mrf.mxu3 }
 0x2e2   : > { %v1578_v22 = vadd.f32 %v1577_v47, %v1453_v46 }
 0x2e5   : > { %v1702_v33 = vpop.f32.mrf.mxu0 }
 0x2e6   : > { %v1703_v27 = vadd.f32 %v1702_v33, %v1578_v22  ;;  %2409 = vmatmul.msk.f32.gmra.mxu3 %vm1263_vm1, %v3471_v59 }
 0x2e8   : > { %1945 = vmatmul.f32.gmra.mxu2 %v3781_v44  ;;  %2164 = vst [vmem:[%s3742_s10 + $0x150] sm:$0xff] %v1703_v27  ;;  %v1459_v44 = vadd.f32 %v3868_v55, %v4072_v51 }
 0x2e9   : > { %v1580_v7 = vpop.f32.mrf.mxu3 }
 0x2ea   : > { %v1581_v34 = vadd.f32 %v1580_v7, %v1456_v39 }
 0x2ed   : > { %v1705_v48 = vpop.f32.mrf.mxu0 }
 0x2ee   : > { %v1706_v53 = vadd.f32 %v1705_v48, %v1581_v34  ;;  %2410 = vmatmul.msk.f32.gmra.mxu3 %vm1263_vm1, %v3491_v56 }
 0x2f0   : > { %1948 = vmatmul.f32.gmra.mxu2 %v3804_v57  ;;  %2166 = vst [vmem:[%s3742_s10 + $0x160] sm:$0xff] %v1706_v53  ;;  %v1462_v57 = vadd.f32 %v3893_v52, %v4051_v0 }
 0x2f1   : > { %v1583_v59 = vpop.f32.mrf.mxu3 }
 0x2f2   : > { %v1584_v9 = vadd.f32 %v1583_v59, %v1459_v44  ;;  %v4667_v59 = vld [vmem:[#allocation60_spill] sm:$0xff] }
 0x2f5   : > { %v1708_v20 = vpop.f32.mrf.mxu0 }
 0x2f6   : > { %v1709_v8 = vadd.f32 %v1708_v20, %v1584_v9  ;;  %2411 = vmatmul.msk.f32.gmra.mxu3 %vm1263_vm1, %v3511_v25  ;;  %v4250_v25 = vpop.f32.mrf.mxu2  ;;  %v4668_v9 = vld [vmem:[#allocation16_spill] sm:$0xff] }
 0x2f8   : > { %1951 = vmatmul.f32.gmra.mxu2 %v3827_v37  ;;  %2168 = vst [vmem:[%s3742_s10 + $0x170] sm:$0xff] %v1709_v8  ;;  %v1465_v37 = vadd.f32 %v3918_v32, %v4081_v24 }
 0x2f9   : > { %v1586_v56 = vpop.f32.mrf.mxu3 }
 0x2fa   : > { %v1587_v38 = vadd.f32 %v1586_v56, %v1462_v57 }
 0x2fd   : > { %v1711_v42 = vpop.f32.mrf.mxu0 }
 0x2fe   : > { %v1712_v61 = vadd.f32 %v1711_v42, %v1587_v38  ;;  %2412 = vmatmul.msk.f32.gmra.mxu3 %vm1263_vm1, %v3531_v49  ;;  %v1468_v49 = vadd.f32 %v3941_v5, %v4106_v6  ;;  %v4258_v32 = vpop.f32.mrf.mxu2  ;;  %v4670_v42 = vld [vmem:[#allocation66_spill] sm:$0xff] }
 0x300   : > { %1954 = vmatmul.f32.gmra.mxu2 %v3852_v3  ;;  %2170 = vst [vmem:[%s3742_s10 + $0x180] sm:$0xff] %v1712_v61  ;;  %v4671_v61 = vld [vmem:[#allocation18_spill] sm:$0xff] }
 0x301   : > { %v1589_v55 = vpop.f32.mrf.mxu3 }
 0x302   : > { %v1590_v40 = vadd.f32 %v1589_v55, %v1465_v37  ;;  %v1483_v37 = vadd.f32 %v4070_v29, %v4145_v26 }
 0x305   : > { %v1714_v52 = vpop.f32.mrf.mxu0 }
 0x306   : > { %v1715_v18 = vadd.f32 %v1714_v52, %v1590_v40  ;;  %2413 = vmatmul.msk.f32.gmra.mxu3 %vm1263_vm1, %v3551_v63  ;;  %v1471_v63 = vadd.f32 %v3968_v43, %v4088_v12  ;;  %v4266_v27 = vpop.f32.mrf.mxu2 }
 0x308   : > { %1957 = vmatmul.f32.gmra.mxu2 %v3875_v16  ;;  %2172 = vst [vmem:[%s3742_s10 + $0x190] sm:$0xff] %v1715_v18 }
 0x309   : > { %v1592_v3 = vpop.f32.mrf.mxu3 }
 0x30a   : > { %v1593_v4 = vadd.f32 %v1592_v3, %v1468_v49  ;;  %v4672_v3 = vld [vmem:[#allocation72_spill] sm:$0xff] }
 0x30d   : > { %v1717_v46 = vpop.f32.mrf.mxu0 }
 0x30e   : > { %v1718_v47 = vadd.f32 %v1717_v46, %v1593_v4  ;;  %2414 = vmatmul.msk.f32.gmra.mxu3 %vm1263_vm1, %v3571_v19  ;;  %v1474_v19 = vadd.f32 %v3995_v17, %v4113_v50  ;;  %v4280_v48 = vpop.f32.mrf.mxu2  ;;  %v4673_v4 = vld [vmem:[#allocation20_spill] sm:$0xff]  ;;  %v1486_v46 = vadd.f32 %v4097_v10, %v4171_v54 }
 0x310   : > { %1960 = vmatmul.f32.gmra.mxu2 %v3900_v60  ;;  %2174 = vst [vmem:[%s3742_s10 + $0x1a0] sm:$0xff] %v1718_v47 }
 0x311   : > { %v1595_v16 = vpop.f32.mrf.mxu3 }
 0x312   : > { %v1596_v22 = vadd.f32 %v1595_v16, %v1471_v63 }
 0x315   : > { %v1720_v5 = vpop.f32.mrf.mxu0 }
 0x316   : > { %v1721_v33 = vadd.f32 %v1720_v5, %v1596_v22  ;;  %2415 = vmatmul.msk.f32.gmra.mxu3 %vm1263_vm1, %v3591_v36  ;;  %v4288_v8 = vpop.f32.mrf.mxu2  ;;  %v4674_v5 = vld [vmem:[#allocation76_spill] sm:$0xff] }
 0x318   : > { %1963 = vmatmul.f32.gmra.mxu2 %v3927_v58  ;;  %2176 = vst [vmem:[%s3742_s10 + $0x1b0] sm:$0xff] %v1721_v33  ;;  %v4666_v58 = vld [vmem:[#allocation70_spill] sm:$0xff] }
 0x319   : > { %v1598_v60 = vpop.f32.mrf.mxu3  ;;  %v1477_v34 = vadd.f32 %v4666_v58, %v4138_v62  ;;  %v4675_v33 = vld [vmem:[#allocation22_spill] sm:$0xff]  ;;  %v4677_v58 = vld [vmem:[#allocation24_spill] sm:$0xff] }
 0x31a   : > { %v1599_v39 = vadd.f32 %v1598_v60, %v1474_v19  ;;  %v1489_v19 = vadd.f32 %v4124_v14, %v4149_v13 }
 0x31d   : > { %v1723_v43 = vpop.f32.mrf.mxu0 }
 0x31e   : > { %v1724_v7 = vadd.f32 %v1723_v43, %v1599_v39  ;;  %2416 = vmatmul.msk.f32.gmra.mxu3 %vm1263_vm1, %v3611_v35  ;;  %v4296_v52 = vpop.f32.mrf.mxu2 }
 0x320   : > { %1966 = vmatmul.f32.gmra.mxu2 %v3952_v2  ;;  %2178 = vst [vmem:[%s3742_s10 + $0x1c0] sm:$0xff] %v1724_v7  ;;  %v4669_v2 = vld [vmem:[#allocation74_spill] sm:$0xff]  ;;  %v4676_v7 = vld [vmem:[#allocation79_spill] sm:$0xff] }
 0x321   : > { %v1601_v36 = vpop.f32.mrf.mxu3  ;;  %v1480_v35 = vadd.f32 %v4669_v2, %v4117_v1  ;;  %v1495_v2 = vadd.f32 %v4185_v45, %v4199_v30 }
 0x322   : > { %v1602_v53 = vadd.f32 %v1601_v36, %v1477_v34  ;;  %v4678_v34 = vld [vmem:[#allocation87_spill] sm:$0xff] }
 0x323   : > { %v1492_v36 = vadd.f32 %v4678_v34, %v4175_v23  ;;  %v4694_v34 = vld [vmem:[#allocation38_spill] sm:$0xff] }
 0x325   : > { %v1726_v17 = vpop.f32.mrf.mxu0 }
 0x326   : > { %v1727_v44 = vadd.f32 %v1726_v17, %v1602_v53  ;;  %2417 = vmatmul.msk.f32.gmra.mxu3 %vm1263_vm1, %v4668_v9  ;;  %v4304_v22 = vpop.f32.mrf.mxu2  ;;  %v4680_v9 = vld [vmem:[#allocation26_spill] sm:$0xff] }
 0x328   : > { %1969 = vmatmul.f32.gmra.mxu2 %v4667_v59  ;;  %2180 = vst [vmem:[%s3742_s10 + $0x1d0] sm:$0xff] %v1727_v44  ;;  %v4679_v59 = vld [vmem:[#allocation82_spill] sm:$0xff] }
 0x329   : > { %v1604_v20 = vpop.f32.mrf.mxu3 }
 0x32a   : > { %v1605_v57 = vadd.f32 %v1604_v20, %v1480_v35 }
 0x32d   : > { %v1729_v56 = vpop.f32.mrf.mxu0 }
 0x32e   : > { %v1730_v38 = vadd.f32 %v1729_v56, %v1605_v57  ;;  %2418 = vmatmul.msk.f32.gmra.mxu3 %vm1263_vm1, %v4671_v61  ;;  %v4318_v53 = vpop.f32.mrf.mxu2 }
 0x330   : > { %1972 = vmatmul.f32.gmra.mxu2 %v4670_v42  ;;  %2182 = vst [vmem:[%s3742_s10 + $0x1e0] sm:$0xff] %v1730_v38  ;;  %v4681_v38 = vld [vmem:[#allocation27_spill] sm:$0xff]  ;;  %v4682_v42 = vld [vmem:[#allocation5_spill] sm:$0xff] }
 0x331   : > { %v1607_v55 = vpop.f32.mrf.mxu3  ;;  %v1768_v61 = vadd.f32 %v4682_v42, %v4681_v38 }
 0x332   : > { %v1608_v40 = vadd.f32 %v1607_v55, %v1483_v37  ;;  %v4683_v37 = vld [vmem:[#allocation85_spill] sm:$0xff] }
 0x333   : > { %v4684_v55 = vld [vmem:[#allocation29_spill] sm:$0xff] }
 0x335   : > { %v1732_v18 = vpop.f32.mrf.mxu0 }
 0x336   : > { %v1733_v49 = vadd.f32 %v1732_v18, %v1608_v40  ;;  %2419 = vmatmul.msk.f32.gmra.mxu3 %vm1263_vm1, %v4673_v4  ;;  %v4326_v20 = vpop.f32.mrf.mxu2  ;;  %v1893_v40 = vadd.f32 %v4250_v25, %v1768_v61  ;;  %v4689_v25 = vld [vmem:[#allocation33_spill] sm:$0xff] }
 0x338   : > { %1975 = vmatmul.f32.gmra.mxu2 %v4672_v3  ;;  %2184 = vst [vmem:[%s3742_s10 + $0x1f0] sm:$0xff] %v1733_v49  ;;  %v4685_v49 = vld [vmem:[#allocation30_spill] sm:$0xff] }
 0x339   : > { %v1610_v47 = vpop.f32.mrf.mxu3  ;;  %v4686_v3 = vld [vmem:[#allocation6_spill] sm:$0xff] }
 0x33a   : > { %v1611_v63 = vadd.f32 %v1610_v47, %v1486_v46  ;;  %v1771_v4 = vadd.f32 %v4686_v3, %v4685_v49  ;;  %v4687_v46 = vld [vmem:[#allocation89_spill] sm:$0xff]  ;;  %v4688_v47 = vld [vmem:[#allocation32_spill] sm:$0xff] }
 0x33d   : > { %v1735_v29 = vpop.f32.mrf.mxu0 }
 0x33e   : > { %v1736_v16 = vadd.f32 %v1735_v29, %v1611_v63  ;;  %2420 = vmatmul.msk.f32.gmra.mxu3 %vm1263_vm1, %v4675_v33  ;;  %v1919_v30 = vpop.f32.mrf.mxu2  ;;  %v1896_v63 = vadd.f32 %v4258_v32, %v1771_v4  ;;  %v4692_v32 = vld [vmem:[#allocation36_spill] sm:$0xff]  ;;  %v4704_v4 = vld [vmem:[#allocation49_spill] sm:$0xff] }
 0x340   : > { %1978 = vmatmul.f32.gmra.mxu2 %v4674_v5  ;;  %2186 = vst [vmem:[%s3742_s10 + $0x200] sm:$0xff] %v1736_v16  ;;  %v4690_v5 = vld [vmem:[#allocation7_spill] sm:$0xff] }
 0x341   : > { %v1613_v60 = vpop.f32.mrf.mxu3  ;;  %v1774_v33 = vadd.f32 %v4690_v5, %v4689_v25  ;;  %v4707_v5 = vld [vmem:[#allocation46_spill] sm:$0xff] }
 0x342   : > { %v1614_v39 = vadd.f32 %v1613_v60, %v1489_v19  ;;  %v4691_v60 = vld [vmem:[#allocation35_spill] sm:$0xff] }
 0x345   : > { %v1738_v10 = vpop.f32.mrf.mxu0 }
 0x346   : > { %v1739_v43 = vadd.f32 %v1738_v10, %v1614_v39  ;;  %2421 = vmatmul.msk.f32.gmra.mxu3 %vm1263_vm1, %v4677_v58  ;;  %v1922_v19 = vpop.f32.mrf.mxu2  ;;  %v1899_v39 = vadd.f32 %v4266_v27, %v1774_v33 }
 0x348   : > { %1981 = vmatmul.f32.gmra.mxu2 %v4676_v7  ;;  %2188 = vst [vmem:[%s3742_s10 + $0x210] sm:$0xff] %v1739_v43  ;;  %v4693_v7 = vld [vmem:[#allocation8_spill] sm:$0xff] }
 0x349   : > { %v1616_v17 = vpop.f32.mrf.mxu3  ;;  %v1777_v58 = vadd.f32 %v4693_v7, %v4692_v32  ;;  %v4710_v7 = vld [vmem:[#allocation50_spill] sm:$0xff] }
 0x34a   : > { %v1617_v44 = vadd.f32 %v1616_v17, %v1492_v36 }
 0x34b   : > { %v1902_v36 = vadd.f32 %v4280_v48, %v1777_v58  ;;  %v4700_v48 = vld [vmem:[#allocation44_spill] sm:$0xff] }
 0x34d   : > { %v1741_v14 = vpop.f32.mrf.mxu0 }
 0x34e   : > { %v1742_v13 = vadd.f32 %v1741_v14, %v1617_v44  ;;  %2422 = vmatmul.msk.f32.gmra.mxu3 %vm1263_vm1, %v4680_v9  ;;  %v4695_v44 = vld [vmem:[#allocation39_spill] sm:$0xff]  ;;  %v4696_v14 = vld [vmem:[#allocation9_spill] sm:$0xff] }
 0x350   : > { %1984 = vmatmul.f32.gmra.mxu2 %v4679_v59  ;;  %2190 = vst [vmem:[%s3742_s10 + $0x220] sm:$0xff] %v1742_v13  ;;  %v1780_v13 = vadd.f32 %v4696_v14, %v4695_v44  ;;  %v4697_v59 = vld [vmem:[#allocation41_spill] sm:$0xff]  ;;  %v4713_v44 = vld [vmem:[#allocation54_spill] sm:$0xff]  ;;  %v4714_v14 = vld [vmem:[#allocation15_spill] sm:$0xff] }
 0x351   : > { %v1619_v35 = vpop.f32.mrf.mxu3 }
 0x352   : > { %v1620_v23 = vadd.f32 %v1619_v35, %v1495_v2  ;;  %v1905_v27 = vadd.f32 %v4288_v8, %v1780_v13  ;;  %v4698_v35 = vld [vmem:[#allocation42_spill] sm:$0xff]  ;;  %v1798_v13 = vadd.f32 %v4714_v14, %v4713_v44  ;;  %v4732_v44 = vld [vmem:[#allocation28_spill] sm:$0xff] }
 0x355   : > { %v1744_v57 = vpop.f32.mrf.mxu0 }
 0x356   : > { %v1745_v56 = vadd.f32 %v1744_v57, %v1620_v23  ;;  %2423 = vmatmul.msk.f32.gmra.mxu3 %vm1263_vm1, %v4684_v55  ;;  %v4699_v23 = vld [vmem:[#allocation10_spill] sm:$0xff]  ;;  %v4702_v55 = vld [vmem:[#allocation11_spill] sm:$0xff] }
 0x357   : > { %v1783_v57 = vadd.f32 %v4699_v23, %v4698_v35  ;;  %v4716_v35 = vld [vmem:[#allocation51_spill] sm:$0xff]  ;;  %v4717_v23 = vld [vmem:[#allocation17_spill] sm:$0xff] }
 0x358   : > { %1987 = vmatmul.f32.gmra.mxu2 %v4683_v37  ;;  %2192 = vst [vmem:[%s3742_s10 + $0x230] sm:$0xff] %v1745_v56  ;;  %v1925_v56 = vpop.f32.mrf.mxu2  ;;  %v4701_v37 = vld [vmem:[#allocation45_spill] sm:$0xff] }
 0x359   : > { %v2017_v18 = vpop.f32.mrf.mxu3  ;;  %v1908_v38 = vadd.f32 %v4296_v52, %v1783_v57  ;;  %v1786_v8 = vadd.f32 %v4702_v55, %v4701_v37  ;;  %v1801_v57 = vadd.f32 %v4717_v23, %v4716_v35  ;;  %v4719_v37 = vld [vmem:[#allocation56_spill] sm:$0xff]  ;;  %v4720_v55 = vld [vmem:[#allocation19_spill] sm:$0xff] }
 0x35a   : > { %v2018_v45 = vadd.f32 %v2017_v18, %v1893_v40  ;;  %v4703_v40 = vld [vmem:[#allocation48_spill] sm:$0xff]  ;;  %v4735_v35 = vld [vmem:[#allocation31_spill] sm:$0xff] }
 0x35b   : > { %v1911_v18 = vadd.f32 %v4304_v22, %v1786_v8  ;;  %v4708_v22 = vld [vmem:[#allocation13_spill] sm:$0xff]  ;;  %v1804_v8 = vadd.f32 %v4720_v55, %v4719_v37 }
 0x35c   : > { %2125 = vst [vmem:[%s3742_s10 + $0x18] sm:$0xff] %v2018_v45  ;;  %v1792_v33 = vadd.f32 %v4708_v22, %v4707_v5  ;;  %v4725_v5 = vld [vmem:[#allocation57_spill] sm:$0xff]  ;;  %v4726_v22 = vld [vmem:[#allocation23_spill] sm:$0xff] }
 0x35e   : > { %2424 = vmatmul.msk.f32.gmra.mxu3 %vm1263_vm1, %v4688_v47  ;;  %v4706_v47 = vld [vmem:[#allocation53_spill] sm:$0xff] }
 0x360   : > { %1990 = vmatmul.f32.gmra.mxu2 %v4687_v46  ;;  %v1928_v45 = vpop.f32.mrf.mxu2  ;;  %v4705_v46 = vld [vmem:[#allocation12_spill] sm:$0xff] }
 0x361   : > { %v2020_v29 = vpop.f32.mrf.mxu3  ;;  %v1789_v52 = vadd.f32 %v4705_v46, %v4704_v4  ;;  %v4722_v4 = vld [vmem:[#allocation61_spill] sm:$0xff] }
 0x362   : > { %v2021_v16 = vadd.f32 %v2020_v29, %v1896_v63  ;;  %v4723_v46 = vld [vmem:[#allocation21_spill] sm:$0xff] }
 0x363   : > { %v1914_v63 = vadd.f32 %v4318_v53, %v1789_v52  ;;  %v4711_v53 = vld [vmem:[#allocation14_spill] sm:$0xff]  ;;  %v4724_v52 = vld [vmem:[#allocation80_spill] sm:$0xff] }
 0x364   : > { %2127 = vst [vmem:[%s3742_s10 + $0x28] sm:$0xff] %v2021_v16  ;;  %v1795_v58 = vadd.f32 %v4711_v53, %v4710_v7  ;;  %v4729_v7 = vld [vmem:[#allocation25_spill] sm:$0xff] }
 0x366   : > { %2425 = vmatmul.msk.f32.gmra.mxu3 %vm1263_vm1, %v4691_v60  ;;  %v4709_v60 = vld [vmem:[#allocation58_spill] sm:$0xff] }
 0x368   : > { %1993 = vmatmul.f32.gmra.mxu2 %v4183_v15  ;;  %v1931_v25 = vpop.f32.mrf.mxu2 }
 0x369   : > { %v2023_v10 = vpop.f32.mrf.mxu3 }
 0x36a   : > { %v2024_v43 = vadd.f32 %v2023_v10, %v1899_v39  ;;  %v1917_v39 = vadd.f32 %v4326_v20, %v1792_v33  ;;  %v4715_v20 = vld [vmem:[#allocation67_spill] sm:$0xff] }
 0x36b   : > { %v4727_v33 = vld [vmem:[#allocation83_spill] sm:$0xff] }
 0x36c   : > { %2129 = vst [vmem:[%s3742_s10 + $0x38] sm:$0xff] %v2024_v43 }
 0x36e   : > { %2426 = vmatmul.msk.f32.gmra.mxu3 %vm1263_vm1, %v4694_v34  ;;  %v4712_v34 = vld [vmem:[#allocation62_spill] sm:$0xff] }
 0x370   : > { %v1934_v32 = vpop.f32.mrf.mxu2 }
 0x371   : > { %v2026_v17 = vpop.f32.mrf.mxu3 }
 0x372   : > { %v2027_v15 = vadd.f32 %v2026_v17, %v1902_v36  ;;  %v1920_v36 = vadd.f32 %v1919_v30, %v1795_v58  ;;  %v4718_v30 = vld [vmem:[#allocation73_spill] sm:$0xff] }
 0x374   : > { %2131 = vst [vmem:[%s3742_s10 + $0x48] sm:$0xff] %v2027_v15 }
 0x376   : > { %2427 = vmatmul.msk.f32.gmra.mxu3 %vm1263_vm1, %v4697_v59 }
 0x378   : > { %v1937_v59 = vpop.f32.mrf.mxu2 }
 0x379   : > { %v2029_v9 = vpop.f32.mrf.mxu3 }
 0x37a   : > { %v2030_v2 = vadd.f32 %v2029_v9, %v1905_v27  ;;  %v1923_v27 = vadd.f32 %v1922_v19, %v1798_v13  ;;  %v4721_v19 = vld [vmem:[#allocation77_spill] sm:$0xff] }
 0x37c   : > { %2133 = vst [vmem:[%s3742_s10 + $0x58] sm:$0xff] %v2030_v2 }
 0x37e   : > { %2428 = vmatmul.msk.f32.gmra.mxu3 %vm1263_vm1, %v4700_v48  ;;  %v1926_v48 = vadd.f32 %v1925_v56, %v1801_v57  ;;  %v1807_v56 = vadd.f32 %v4723_v46, %v4722_v4  ;;  %v4739_v4 = vld [vmem:[#allocation40_spill] sm:$0xff] }
 0x37f   : > { %v1828_v46 = vadd.f32 %v4739_v4, %v4018_v41 }
 0x381   : > { %v2032_v42 = vpop.f32.mrf.mxu3 }
 0x382   : > { %v2033_v61 = vadd.f32 %v2032_v42, %v1908_v38  ;;  %v1940_v38 = vpop.f32.mrf.mxu2 }
 0x384   : > { %2135 = vst [vmem:[%s3742_s10 + $0x68] sm:$0xff] %v2033_v61 }
 0x386   : > { %2429 = vmatmul.msk.f32.gmra.mxu3 %vm1263_vm1, %v4703_v40  ;;  %v1929_v40 = vadd.f32 %v1928_v45, %v1804_v8  ;;  %v1810_v45 = vadd.f32 %v4726_v22, %v4725_v5 }
 0x389   : > { %v2035_v49 = vpop.f32.mrf.mxu3 }
 0x38a   : > { %v2036_v3 = vadd.f32 %v2035_v49, %v1911_v18 }
 0x38c   : > { %2137 = vst [vmem:[%s3742_s10 + $0x78] sm:$0xff] %v2036_v3  ;;  %v1943_v3 = vpop.f32.mrf.mxu2 }
 0x38e   : > { %2430 = vmatmul.msk.f32.gmra.mxu3 %vm1263_vm1, %v4706_v47  ;;  %v1932_v47 = vadd.f32 %v1931_v25, %v1807_v56  ;;  %v4730_v25 = vld [vmem:[#allocation86_spill] sm:$0xff] }
 0x391   : > { %v2038_v29 = vpop.f32.mrf.mxu3 }
 0x392   : > { %v2039_v16 = vadd.f32 %v2038_v29, %v1914_v63 }
 0x394   : > { %2139 = vst [vmem:[%s3742_s10 + $0x88] sm:$0xff] %v2039_v16  ;;  %v1946_v16 = vpop.f32.mrf.mxu2 }
 0x396   : > { %2431 = vmatmul.msk.f32.gmra.mxu3 %vm1263_vm1, %v4709_v60  ;;  %v1935_v60 = vadd.f32 %v1934_v32, %v1810_v45  ;;  %v4733_v32 = vld [vmem:[#allocation90_spill] sm:$0xff]  ;;  %v4741_v45 = vld [vmem:[#allocation47_spill] sm:$0xff] }
 0x399   : > { %v2041_v10 = vpop.f32.mrf.mxu3 }
 0x39a   : > { %v2042_v43 = vadd.f32 %v2041_v10, %v1917_v39 }
 0x39c   : > { %2141 = vst [vmem:[%s3742_s10 + $0x98] sm:$0xff] %v2042_v43  ;;  %v4728_v43 = vld [vmem:[#allocation63_spill] sm:$0xff]  ;;  %v1949_v58 = vpop.f32.mrf.mxu2 }
 0x39d   : > { %v1813_v53 = vadd.f32 %v4729_v7, %v4728_v43  ;;  %v4742_v43 = vld [vmem:[#allocation52_spill] sm:$0xff] }
 0x39e   : > { %2432 = vmatmul.msk.f32.gmra.mxu3 %vm1263_vm1, %v4712_v34  ;;  %v1837_v7 = vadd.f32 %v4742_v43, %v4051_v0 }
 0x39f   : > { %v1938_v34 = vadd.f32 %v1937_v59, %v1813_v53 }
 0x3a1   : > { %v2044_v17 = vpop.f32.mrf.mxu3 }
 0x3a2   : > { %v2045_v15 = vadd.f32 %v2044_v17, %v1920_v36 }
 0x3a4   : > { %2143 = vst [vmem:[%s3742_s10 + $0xa8] sm:$0xff] %v2045_v15  ;;  %v4731_v15 = vld [vmem:[#allocation68_spill] sm:$0xff] }
 0x3a5   : > { %v1816_v14 = vadd.f32 %v4732_v44, %v4731_v15  ;;  %v4744_v44 = vld [vmem:[#allocation59_spill] sm:$0xff] }
 0x3a6   : > { %2433 = vmatmul.msk.f32.gmra.mxu3 %vm1263_vm1, %v4715_v20  ;;  %v1952_v20 = vpop.f32.mrf.mxu2 }
 0x3a7   : > { %v1941_v13 = vadd.f32 %v1940_v38, %v1816_v14  ;;  %v1843_v14 = vadd.f32 %v4744_v44, %v4106_v6 }
 0x3a9   : > { %v2047_v9 = vpop.f32.mrf.mxu3 }
 0x3aa   : > { %v2048_v2 = vadd.f32 %v2047_v9, %v1923_v27 }
 0x3ac   : > { %2145 = vst [vmem:[%s3742_s10 + $0xb8] sm:$0xff] %v2048_v2  ;;  %v4734_v2 = vld [vmem:[#allocation64_spill] sm:$0xff] }
 0x3ad   : > { %v1819_v23 = vadd.f32 %v4735_v35, %v4734_v2 }
 0x3ae   : > { %2434 = vmatmul.msk.f32.gmra.mxu3 %vm1263_vm1, %v4718_v30 }
 0x3af   : > { %v1944_v59 = vadd.f32 %v1943_v3, %v1819_v23 }
 0x3b1   : > { %v2050_v42 = vpop.f32.mrf.mxu3 }
 0x3b2   : > { %v2051_v61 = vadd.f32 %v2050_v42, %v1926_v48  ;;  %v1955_v48 = vpop.f32.mrf.mxu2  ;;  %v4736_v42 = vld [vmem:[#allocation69_spill] sm:$0xff] }
 0x3b4   : > { %2147 = vst [vmem:[%s3742_s10 + $0xc8] sm:$0xff] %v2051_v61  ;;  %v4737_v61 = vld [vmem:[#allocation34_spill] sm:$0xff] }
 0x3b5   : > { %v1822_v38 = vadd.f32 %v4737_v61, %v4736_v42  ;;  %v4747_v61 = vld [vmem:[#allocation75_spill] sm:$0xff] }
 0x3b6   : > { %2435 = vmatmul.msk.f32.gmra.mxu3 %vm1263_vm1, %v4721_v19 }
 0x3b7   : > { %v1947_v37 = vadd.f32 %v1946_v16, %v1822_v38  ;;  %v1852_v38 = vadd.f32 %v4747_v61, %v4138_v62 }
 0x3b9   : > { %v2053_v18 = vpop.f32.mrf.mxu3 }
 0x3ba   : > { %v2054_v49 = vadd.f32 %v2053_v18, %v1929_v40  ;;  %v1958_v19 = vpop.f32.mrf.mxu2 }
 0x3bc   : > { %2149 = vst [vmem:[%s3742_s10 + $0xd8] sm:$0xff] %v2054_v49 }
 0x3be   : > { %2436 = vmatmul.msk.f32.gmra.mxu3 %vm1263_vm1, %v4724_v52 }
 0x3c1   : > { %v2056_v63 = vpop.f32.mrf.mxu3 }
 0x3c2   : > { %v2057_v29 = vadd.f32 %v2056_v63, %v1932_v47  ;;  %v1961_v56 = vpop.f32.mrf.mxu2  ;;  %v4740_v63 = vld [vmem:[#allocation43_spill] sm:$0xff] }
 0x3c4   : > { %2151 = vst [vmem:[%s3742_s10 + $0xe8] sm:$0xff] %v2057_v29  ;;  %v1831_v29 = vadd.f32 %v4740_v63, %v4047_v11  ;;  %v1962_v11 = vadd.f32 %v1961_v56, %v1837_v7 }
 0x3c6   : > { %2437 = vmatmul.msk.f32.gmra.mxu3 %vm1263_vm1, %v4727_v33  ;;  %v1956_v16 = vadd.f32 %v1955_v48, %v1831_v29  ;;  %v1834_v33 = vadd.f32 %v4741_v45, %v4072_v51  ;;  %v4752_v45 = vld [vmem:[#allocation91_spill] sm:$0xff] }
 0x3c8   : > { %v1959_v41 = vadd.f32 %v1958_v19, %v1834_v33  ;;  %v4748_v19 = vld [vmem:[#allocation78_spill] sm:$0xff] }
 0x3c9   : > { %v2059_v39 = vpop.f32.mrf.mxu3 }
 0x3ca   : > { %v2060_v10 = vadd.f32 %v2059_v39, %v1935_v60 }
 0x3cc   : > { %2153 = vst [vmem:[%s3742_s10 + $0xf8] sm:$0xff] %v2060_v10 }
 0x3ce   : > { %2438 = vmatmul.msk.f32.gmra.mxu3 %vm1263_vm1, %v4730_v25 }
 0x3d1   : > { %v2062_v36 = vpop.f32.mrf.mxu3 }
 0x3d2   : > { %v2063_v17 = vadd.f32 %v2062_v36, %v1938_v34  ;;  %v4743_v34 = vld [vmem:[#allocation55_spill] sm:$0xff] }
 0x3d3   : > { %v1840_v36 = vadd.f32 %v4743_v34, %v4081_v24 }
 0x3d4   : > { %2155 = vst [vmem:[%s3742_s10 + $0x108] sm:$0xff] %v2063_v17 }
 0x3d6   : > { %2439 = vmatmul.msk.f32.gmra.mxu3 %vm1263_vm1, %v4733_v32 }
 0x3d9   : > { %v2065_v27 = vpop.f32.mrf.mxu3 }
 0x3da   : > { %v2066_v9 = vadd.f32 %v2065_v27, %v1941_v13  ;;  %v4745_v27 = vld [vmem:[#allocation65_spill] sm:$0xff] }
 0x3dc   : > { %2157 = vst [vmem:[%s3742_s10 + $0x118] sm:$0xff] %v2066_v9  ;;  %v1846_v9 = vadd.f32 %v4745_v27, %v4088_v12 }
 0x3de   : > { %2440 = vmatmul.msk.f32.gmra.mxu3 %vm1263_vm1, %v4190_v28  ;;  %v4738_v28 = vld [vmem:[#allocation37_spill] sm:$0xff] }
 0x3df   : > { %v1825_v40 = vadd.f32 %v4738_v28, %v4041_v21  ;;  %v1964_v21 = vpop.f32.mrf.mxu2  ;;  %v1855_v28 = vadd.f32 %v4748_v19, %v4117_v1 }
 0x3e0   : > { %v1965_v51 = vadd.f32 %v1964_v21, %v1840_v36 }
 0x3e1   : > { %v2068_v57 = vpop.f32.mrf.mxu3  ;;  %v1950_v18 = vadd.f32 %v1949_v58, %v1825_v40 }
 0x3e2   : > { %v2069_v30 = vadd.f32 %v2068_v57, %v1944_v59  ;;  %v4746_v59 = vld [vmem:[#allocation71_spill] sm:$0xff] }
 0x3e3   : > { %v1849_v57 = vadd.f32 %v4746_v59, %v4113_v50 }
 0x3e4   : > { %2159 = vst [vmem:[%s3742_s10 + $0x128] sm:$0xff] %v2069_v30 }
 0x3e6   : > { %2441 = vmatmul.msk.f32.gmra.mxu3 %vm1263_vm1, %v4207_v31  ;;  %v1953_v31 = vadd.f32 %v1952_v20, %v1828_v46 }
 0x3e7   : > { %v1967_v10 = vpop.f32.mrf.mxu2 }
 0x3e8   : > { %v1968_v0 = vadd.f32 %v1967_v10, %v1843_v14 }
 0x3e9   : > { %v2071_v55 = vpop.f32.mrf.mxu3 }
 0x3ea   : > { %v2072_v8 = vadd.f32 %v2071_v55, %v1947_v37 }
 0x3ec   : > { %2161 = vst [vmem:[%s3742_s10 + $0x138] sm:$0xff] %v2072_v8 }
 0x3ef   : > { %v1970_v58 = vpop.f32.mrf.mxu2 }
 0x3f0   : > { %v1971_v2 = vadd.f32 %v1970_v58, %v1846_v9 }
 0x3f1   : > { %v2074_v49 = vpop.f32.mrf.mxu3 }
 0x3f2   : > { %v2075_v3 = vadd.f32 %v2074_v49, %v1950_v18  ;;  %v4749_v49 = vld [vmem:[#allocation81_spill] sm:$0xff] }
 0x3f4   : > { %2163 = vst [vmem:[%s3742_s10 + $0x148] sm:$0xff] %v2075_v3  ;;  %v1858_v3 = vadd.f32 %v4749_v49, %v4145_v26 }
 0x3f7   : > { %v1973_v32 = vpop.f32.mrf.mxu2 }
 0x3f8   : > { %v1974_v6 = vadd.f32 %v1973_v32, %v1849_v57 }
 0x3f9   : > { %v2077_v52 = vpop.f32.mrf.mxu3 }
 0x3fa   : > { %v2078_v47 = vadd.f32 %v2077_v52, %v1953_v31  ;;  %v4750_v31 = vld [vmem:[#allocation84_spill] sm:$0xff] }
 0x3fb   : > { %v1861_v52 = vadd.f32 %v4750_v31, %v4171_v54 }
 0x3fc   : > { %2165 = vst [vmem:[%s3742_s10 + $0x158] sm:$0xff] %v2078_v47 }
 0x3ff   : > { %v1976_v24 = vpop.f32.mrf.mxu2 }
 0x400   : > { %v1977_v12 = vadd.f32 %v1976_v24, %v1852_v38 }
 0x401   : > { %v2080_v5 = vpop.f32.mrf.mxu3 }
 0x402   : > { %v2081_v22 = vadd.f32 %v2080_v5, %v1956_v16  ;;  %v4751_v16 = vld [vmem:[#allocation88_spill] sm:$0xff] }
 0x404   : > { %2167 = vst [vmem:[%s3742_s10 + $0x168] sm:$0xff] %v2081_v22 }
 0x407   : > { %v1979_v42 = vpop.f32.mrf.mxu2 }
 0x408   : > { %v1980_v50 = vadd.f32 %v1979_v42, %v1855_v28 }
 0x409   : > { %v2083_v60 = vpop.f32.mrf.mxu3 }
 0x40a   : > { %v2084_v39 = vadd.f32 %v2083_v60, %v1959_v41 }
 0x40c   : > { %2169 = vst [vmem:[%s3742_s10 + $0x178] sm:$0xff] %v2084_v39  ;;  %v4753_v39 = vld [vmem:[#allocation92_spill] sm:$0xff] }
 0x40f   : > { %v1982_v8 = vpop.f32.mrf.mxu2 }
 0x410   : > { %v1983_v62 = vadd.f32 %v1982_v8, %v1858_v3 }
 0x411   : > { %v2086_v53 = vpop.f32.mrf.mxu3 }
 0x412   : > { %v2087_v25 = vadd.f32 %v2086_v53, %v1962_v11 }
 0x414   : > { %2171 = vst [vmem:[%s3742_s10 + $0x188] sm:$0xff] %v2087_v25 }
 0x417   : > { %v1985_v4 = vpop.f32.mrf.mxu2 }
 0x418   : > { %v1986_v1 = vadd.f32 %v1985_v4, %v1861_v52 }
 0x419   : > { %v2089_v17 = vpop.f32.mrf.mxu3 }
 0x41a   : > { %v2090_v15 = vadd.f32 %v2089_v17, %v1965_v51 }
 0x41c   : > { %2173 = vst [vmem:[%s3742_s10 + $0x198] sm:$0xff] %v2090_v15 }
 0x41f   : > { %v1988_v47 = vpop.f32.mrf.mxu2 }
 0x420   : > { %v1989_v21 = vadd.f32 %v1988_v47, %v4751_v16 }
 0x421   : > { %v2092_v13 = vpop.f32.mrf.mxu3 }
 0x422   : > { %v2093_v20 = vadd.f32 %v2092_v13, %v1968_v0 }
 0x424   : > { %2175 = vst [vmem:[%s3742_s10 + $0x1a8] sm:$0xff] %v2093_v20 }
 0x427   : > { %v1991_v22 = vpop.f32.mrf.mxu2 }
 0x428   : > { %v1992_v33 = vadd.f32 %v1991_v22, %v4752_v45 }
 0x429   : > { %v2095_v35 = vpop.f32.mrf.mxu3 }
 0x42a   : > { %v2096_v23 = vadd.f32 %v2095_v35, %v1971_v2 }
 0x42c   : > { %2177 = vst [vmem:[%s3742_s10 + $0x1b8] sm:$0xff] %v2096_v23 }
 0x42f   : > { %v1994_v60 = vpop.f32.mrf.mxu2 }
 0x430   : > { %v1995_v10 = vadd.f32 %v1994_v60, %v4753_v39 }
 0x431   : > { %v2098_v30 = vpop.f32.mrf.mxu3 }
 0x432   : > { %v2099_v48 = vadd.f32 %v2098_v30, %v1974_v6 }
 0x434   : > { %2179 = vst [vmem:[%s3742_s10 + $0x1c8] sm:$0xff] %v2099_v48 }
 0x439   : > { %v2101_v37 = vpop.f32.mrf.mxu3 }
 0x43a   : > { %v2102_v55 = vadd.f32 %v2101_v37, %v1977_v12 }
 0x43c   : > { %2181 = vst [vmem:[%s3742_s10 + $0x1d8] sm:$0xff] %v2102_v55 }
 0x441   : > { %v2104_v40 = vpop.f32.mrf.mxu3 }
 0x442   : > { %v2105_v18 = vadd.f32 %v2104_v40, %v1980_v50 }
 0x444   : > { %2183 = vst [vmem:[%s3742_s10 + $0x1e8] sm:$0xff] %v2105_v18 }
 0x449   : > { %v2107_v46 = vpop.f32.mrf.mxu3 }
 0x44a   : > { %v2108_v56 = vadd.f32 %v2107_v46, %v1983_v62 }
 0x44c   : > { %2185 = vst [vmem:[%s3742_s10 + $0x1f8] sm:$0xff] %v2108_v56 }
 0x451   : > { %v2110_v63 = vpop.f32.mrf.mxu3 }
 0x452   : > { %v2111_v29 = vadd.f32 %v2110_v63, %v1986_v1 }
 0x454   : > { %2187 = vst [vmem:[%s3742_s10 + $0x208] sm:$0xff] %v2111_v29 }
 0x459   : > { %v2113_v26 = vpop.f32.mrf.mxu3 }
 0x45a   : > { %v2114_v5 = vadd.f32 %v2113_v26, %v1989_v21 }
 0x45c   : > { %2189 = vst [vmem:[%s3742_s10 + $0x218] sm:$0xff] %v2114_v5 }
 0x461   : > { %v2116_v41 = vpop.f32.mrf.mxu3 }
 0x462   : > { %v2117_v54 = vadd.f32 %v2116_v41, %v1992_v33 }
 0x464   : > { %2191 = vst [vmem:[%s3742_s10 + $0x228] sm:$0xff] %v2117_v54 }
 0x469   : > { %v2119_v43 = vpop.f32.mrf.mxu3 }
 0x46a   : > { %v2120_v7 = vadd.f32 %v2119_v43, %v1995_v10 }
 0x46c   : > { %2193 = vst [vmem:[%s3742_s10 + $0x238] sm:$0xff] %v2120_v7 }
 0x46d   : > { %2556 = shalt.err (!%p2553_p5)
}
 0x46e   : > { %s2610_s17 = smov 256   ;;  %s2611_s10 = smov 16  }
 0x46f   : > { %2468 = dma.vmem_to_hbm [thread:$0]  (%p2682_p4), %s2210_s13, 9216, %s2212_s14, %s2195_s21, %s2610_s17, %s2610_s17, %s2611_s10  }
 0x470 PF: > { %p2474_p6 = scmp.ge.s32.totalorder %s2607_s23, 2  ;;  %s2226_s8 = sand.u32 1, %s2587_s18  }
 0x471   : > { %s2227_s9 = scalar_lea.sflag [#allocation3], %s2226_s8 }
 0x472   : > { %p2471_p7 = pnand %p2474_p6, %p2689_p8 }
 0x474   : > { %p2472_p9 = pneg %p2471_p7 }
 0x476   : > { %2582 = dma.done.wait (%p2472_p9), %s2227_s9, 9216  }
 0x477   : > { %2584 = vsyncadd (%p2472_p9), %s2227_s9, 4294958080  ;;  %s18_s23 = sadd.s32 1, %s2607_s23   ;;  %s4754_s18 = smov %s2591_s19 }
 0x478   : > { %p15_p10 = scmp.ge.s32.totalorder %s18_s23, 4   ;;  %s4755_s19 = smov %s2595_s20 }
 0x479   : > { %s4756_s20 = smov %s2695_s6  ;;  %s4757_s21 = smov %s2603_s22 }
 0x47a   : > { %s4758_s22 = smov %s4760_s26  ;;  %17 = sbr.rel (!%p15_p10) target bundleno = 4 (0x4), region = 75 }
 0x47f   :  { %2233 = vsyncpa [#allocation3], 1 }
 0x480   :  { %2235 = vsyncpa [#allocation3 + $0x1], 1 }

</bundles_post_ra>
